<compile_context>
chip_gen: v7x
topology: tpu7x:2x2x1
jax: 0.10.0
libtpu: 0.0.40
codegen_flags: <defaults>
</compile_context>

<pallas_src>
import jax
import jax.numpy as jnp
from jax.experimental import pallas as pl
from jax.experimental.pallas import tpu as pltpu

_LANE = 128


def _round_up(x, m):
    return ((x + m - 1) // m) * m


def _double_conv_kernel(x_ref, w1_ref, b1_ref, w2_ref, b2_ref, o_ref):
    """Fused DoubleConv for one batch element.

    x_ref : (1, H*W, K1p)        bf16 im2col LHS of conv1 (K = 9*Cin, lane-padded)
    w1_ref: (K1p, Cmid_p)        bf16
    b1_ref: (1, Cmid_p)          f32
    w2_ref: (9*Cmid_p, Cmid_p)   bf16, tap-major rows [(dy*3+dx)*Cmid_p + c]
    b2_ref: (1, Cmid_p)          f32
    o_ref : (1, H, W, Cmid_p)    bf16 output (lane-dense channel padding)
    """
    H = o_ref.shape[1]
    W = o_ref.shape[2]
    Cmid_p = o_ref.shape[3]

    # ---- conv1 + ReLU: single im2col matmul (LHS built by the wrapper) ----
    acc1 = jnp.dot(x_ref[0], w1_ref[...], preferred_element_type=jnp.float32)
    acc1 = acc1 + b1_ref[...]
    h = jnp.maximum(acc1, 0.0).astype(w2_ref.dtype).reshape(H, W, Cmid_p)

    # ---- conv2 + ReLU over the VMEM-resident intermediate -----------------
    # Hoisted dx column shifts (only taps dx=0 and dx=2 need a sublane
    # relayout); the zero halo (= conv2's padding=1) is folded in as values,
    # so no scratch / halo-zeroing / cross-step state is needed.
    zc = jnp.zeros((H, 1, Cmid_p), h.dtype)
    zr = jnp.zeros((1, W, Cmid_p), h.dtype)
    shifted = (
        jnp.concatenate([zc, h[:, : W - 1, :]], axis=1),  # dx=0 tap reads x-1
        h,                                                # dx=1 tap reads x
        jnp.concatenate([h[:, 1:, :], zc], axis=1),       # dx=2 tap reads x+1
    )
    h_dx = [jnp.concatenate([zr, s, zr], axis=0) for s in shifted]  # (H+2, W, C)

    # dy shifts are free leading-axis slices; tap accumulation happens in the
    # MXU along the concatenated K instead of as 9 f32 VALU adds.
    taps = [h_dx[dx][dy:dy + H] for dy in range(3) for dx in range(3)]
    lhs2 = jnp.concatenate(taps, axis=-1).reshape(H * W, 9 * Cmid_p)

    acc2 = jnp.dot(lhs2, w2_ref[...], preferred_element_type=jnp.float32)
    acc2 = acc2 + b2_ref[...]
    out = jnp.maximum(acc2, 0.0)
    o_ref[0, :, :, :] = out.reshape(H, W, Cmid_p).astype(o_ref.dtype)


def _prep_w1(w_oihw, b, k1p, cmid_p, dtype):
    """(Cout,Cin,3,3)/(Cout,) -> (K1p, Cmid_p) bf16 + (1, Cmid_p) f32.

    Row order matches the wrapper im2col columns: (dy*3+dx)*Cin + cin.
    """
    cout, cin, kh, kw = w_oihw.shape
    w = jnp.transpose(w_oihw, (2, 3, 1, 0)).reshape(kh * kw * cin, cout)
    w = jnp.pad(w, ((0, k1p - kh * kw * cin), (0, cmid_p - cout))).astype(dtype)
    b = jnp.pad(b, (0, cmid_p - cout)).astype(jnp.float32).reshape(1, cmid_p)
    return w, b


def _prep_w2(w_oihw, b, cmid_p, dtype):
    """(Cout,Cmid,3,3)/(Cout,) -> tap-major (9*Cmid_p, Cmid_p) bf16 + (1,Cmid_p) f32.

    Channel padding is interleaved per tap so rows match the in-kernel im2col
    column order (dy*3+dx)*Cmid_p + c.
    """
    cout, cin, kh, kw = w_oihw.shape
    w = jnp.transpose(w_oihw, (2, 3, 1, 0))                         # (3,3,Cin,Cout)
    w = jnp.pad(w, ((0, 0), (0, 0), (0, cmid_p - cin), (0, cmid_p - cout)))
    w = w.reshape(kh * kw * cmid_p, cmid_p).astype(dtype)
    b = jnp.pad(b, (0, cmid_p - cout)).astype(jnp.float32).reshape(1, cmid_p)
    return w, b


def double_conv_nhwc(x_nhwc, params, *, compute_dtype=jnp.bfloat16):
    """NHWC in (any float dtype) -> NHWC bf16 out with channels padded to 128.

    Use this entry point between chained blocks to avoid NCHW<->NHWC and
    pad/slice round trips through HBM.
    """
    N, H, W, Cin = x_nhwc.shape
    Cout = params["w1"].shape[0]
    K1 = 9 * Cin
    K1p = _round_up(K1, _LANE)
    Cmid_p = _round_up(Cout, _LANE)

    # conv1 im2col in the wrapper: pad the fused K = 9*Cin to the lane width
    # instead of padding Cin to 128 (at Cin=4 this is ~3.5x K waste vs 32x).
    xp = jnp.pad(x_nhwc, ((0, 0), (1, 1), (1, 1), (0, 0)))
    cols = [xp[:, dy:dy + H, dx:dx + W, :] for dy in range(3) for dx in range(3)]
    x_col = jnp.concatenate(cols, axis=-1)                    # (N, H, W, 9*Cin)
    x_col = jnp.pad(x_col, ((0, 0), (0, 0), (0, 0), (0, K1p - K1)))
    x_col = x_col.reshape(N, H * W, K1p).astype(compute_dtype)

    w1, b1 = _prep_w1(params["w1"], params["b1"], K1p, Cmid_p, compute_dtype)
    w2, b2 = _prep_w2(params["w2"], params["b2"], Cmid_p, compute_dtype)

    # VMEM budget from actual block sizes: 2x double-buffered in/out blocks,
    # weights/biases, and in-kernel temporaries; clamped to <= 40 MiB so it is
    # safe within v7x's 64 MiB VMEM (fine on v5e/v6e too).
    bpe = jnp.dtype(compute_dtype).itemsize
    in_blk = H * W * K1p * bpe
    out_blk = H * W * Cmid_p * bpe
    w_bytes = (K1p * Cmid_p + 9 * Cmid_p * Cmid_p) * bpe + 2 * Cmid_p * 4
    interm = H * W * 9 * Cmid_p * bpe                     # conv2 im2col LHS
    interm += 5 * (H + 2) * (W + 2) * Cmid_p * bpe        # shifted copies of h
    interm += 2 * H * W * Cmid_p * 4                      # f32 accumulators
    vmem_need = 2 * (in_blk + out_blk) + 2 * w_bytes + interm + (4 << 20)
    vmem_limit = int(min(max(vmem_need, 16 << 20), 40 << 20))

    return pl.pallas_call(
        _double_conv_kernel,
        out_shape=jax.ShapeDtypeStruct((N, H, W, Cmid_p), compute_dtype),
        grid_spec=pltpu.PrefetchScalarGridSpec(
            num_scalar_prefetch=0,
            grid=(N,),
            in_specs=[
                pl.BlockSpec((1, H * W, K1p), lambda n: (n, 0, 0)),
                pl.BlockSpec((K1p, Cmid_p), lambda n: (0, 0)),
                pl.BlockSpec((1, Cmid_p), lambda n: (0, 0)),
                pl.BlockSpec((9 * Cmid_p, Cmid_p), lambda n: (0, 0)),
                pl.BlockSpec((1, Cmid_p), lambda n: (0, 0)),
            ],
            out_specs=pl.BlockSpec((1, H, W, Cmid_p), lambda n: (n, 0, 0, 0)),
        ),
        compiler_params=pltpu.CompilerParams(
            dimension_semantics=("parallel",),
            vmem_limit_bytes=vmem_limit,
        ),
    )(x_col, w1, b1, w2, b2)


def double_conv_pallas(x_nchw, params, *, compute_dtype=jnp.bfloat16):
    """PyTorch-compatible NCHW float in / NCHW float out wrapper."""
    Cout = params["w1"].shape[0]
    x = jnp.transpose(x_nchw, (0, 2, 3, 1))
    out = double_conv_nhwc(x, params, compute_dtype=compute_dtype)
    return jnp.transpose(out[..., :Cout], (0, 3, 1, 2)).astype(x_nchw.dtype)


def init_down_block_params(key, in_channels, out_channels, dtype=jnp.float32):
    """Deterministic parameter init matching the PyTorch module's shapes."""
    k1, k2, k3, k4 = jax.random.split(key, 4)
    fan1 = in_channels * 9
    w1 = jax.random.uniform(k1, (out_channels, in_channels, 3, 3), dtype,
                            minval=-1.0, maxval=1.0) / jnp.sqrt(fan1)
    b1 = jax.random.uniform(k2, (out_channels,), dtype,
                            minval=-1.0, maxval=1.0) / jnp.sqrt(fan1)
    fan2 = out_channels * 9
    w2 = jax.random.uniform(k3, (out_channels, out_channels, 3, 3), dtype,
                            minval=-1.0, maxval=1.0) / jnp.sqrt(fan2)
    b2 = jax.random.uniform(k4, (out_channels,), dtype,
                            minval=-1.0, maxval=1.0) / jnp.sqrt(fan2)
    return {"w1": w1, "b1": b1, "w2": w2, "b2": b2}


@jax.jit
def down_block_forward(x_nchw, params):
    """DownBlock forward (fused DoubleConv). x: NCHW -> out: NCHW."""
    return double_conv_pallas(x_nchw, params)


def _reference_forward(x_nchw, params):
    """Pure-JAX f32 reference (NCHW conv) for correctness checking."""
    def conv(x, w, b):
        y = jax.lax.conv_general_dilated(
            x, w, window_strides=(1, 1), padding=((1, 1), (1, 1)),
            dimension_numbers=("NCHW", "OIHW", "NCHW"))
        return jnp.maximum(y + b[None, :, None, None], 0.0)
    h = conv(x_nchw, params["w1"], params["b1"])
    return conv(h, params["w2"], params["b2"])


if __name__ == "__main__":
    key = jax.random.PRNGKey(0)
    k_x, k_p = jax.random.split(key)

    N, Cin, H, W = 2, 4, 16, 16
    Cout = 8

    x = jax.random.normal(k_x, (N, Cin, H, W), jnp.float32)
    params = init_down_block_params(k_p, Cin, Cout)

    out = down_block_forward(x, params)
    out = jax.block_until_ready(out)

    ref = _reference_forward(x, params)
    assert out.shape == (N, Cout, H, W), out.shape
    # bf16 activations/weights/output (f32 accumulation) -> relaxed tolerance.
    assert jnp.allclose(out, ref, atol=5e-2, rtol=5e-2), "mismatch vs reference"

    print("KERNEL_OK")
</pallas_src>

<mosaic_0001>
module attributes {stable_mosaic.version = 11 : i64} {
  func.func @_double_conv_kernel(%arg0: i32, %arg1: memref<1x256x128xbf16, #tpu.memory_space<vmem>>, %arg2: memref<128x128xbf16, #tpu.memory_space<vmem>>, %arg3: memref<1x128xf32, #tpu.memory_space<vmem>>, %arg4: memref<1152x128xbf16, #tpu.memory_space<vmem>>, %arg5: memref<1x128xf32, #tpu.memory_space<vmem>>, %arg6: memref<1x16x16x128xbf16, #tpu.memory_space<vmem>>) attributes {dimension_semantics = [#tpu.dimension_semantics<parallel>], iteration_bounds = array<i64: 2>, scalar_prefetch = 0 : i64, scratch_operands = 0 : i64, tpu.core_type = #tpu.core_type<tc>, window_params = [{transform_indices = @transform_0, window_bounds = array<i64: 1, 256, 128>}, {pipeline_mode = #tpu.pipeline_mode<synchronous>, transform_indices = @transform_1, window_bounds = array<i64: 128, 128>}, {pipeline_mode = #tpu.pipeline_mode<synchronous>, transform_indices = @transform_2, window_bounds = array<i64: 1, 128>}, {pipeline_mode = #tpu.pipeline_mode<synchronous>, transform_indices = @transform_3, window_bounds = array<i64: 1152, 128>}, {pipeline_mode = #tpu.pipeline_mode<synchronous>, transform_indices = @transform_4, window_bounds = array<i64: 1, 128>}, {transform_indices = @transform_5, window_bounds = array<i64: 1, 16, 16, 128>}]} {
    %c0 = arith.constant 0 : index
    %c0_0 = arith.constant 0 : index
    %c0_1 = arith.constant 0 : index
    %0 = vector.load %arg1[%c0, %c0_0, %c0_1] : memref<1x256x128xbf16, #tpu.memory_space<vmem>>, vector<1x256x128xbf16>
    %1 = vector.shape_cast %0 : vector<1x256x128xbf16> to vector<256x128xbf16>
    %c0_2 = arith.constant 0 : index
    %c0_3 = arith.constant 0 : index
    %2 = vector.load %arg2[%c0_2, %c0_3] : memref<128x128xbf16, #tpu.memory_space<vmem>>, vector<128x128xbf16>
    %cst = arith.constant dense<0.000000e+00> : vector<256x128xf32>
    %3 = tpu.matmul %1, %2, %cst {dimension_numbers = #tpu.dot_dimension_numbers<[1], [0], [0], [1], [0, 0, 1, 1], [], []>} : vector<256x128xbf16>, vector<128x128xbf16>, vector<256x128xf32> -> vector<256x128xf32>
    %c0_4 = arith.constant 0 : index
    %c0_5 = arith.constant 0 : index
    %4 = vector.load %arg3[%c0_4, %c0_5] : memref<1x128xf32, #tpu.memory_space<vmem>>, vector<1x128xf32>
    %5 = vector.broadcast %4 : vector<1x128xf32> to vector<256x128xf32>
    %6 = arith.addf %3, %5 : vector<256x128xf32>
    %cst_6 = arith.constant 0.000000e+00 : f32
    %7 = vector.broadcast %cst_6 : f32 to vector<256x128xf32>
    %8 = arith.maximumf %6, %7 : vector<256x128xf32>
    %9 = arith.truncf %8 : vector<256x128xf32> to vector<256x128xbf16>
    %10 = vector.shape_cast %9 : vector<256x128xbf16> to vector<16x16x128xbf16>
    %cst_7 = arith.constant 0.000000e+00 : bf16
    %11 = vector.broadcast %cst_7 : bf16 to vector<16x1x128xbf16>
    %cst_8 = arith.constant 0.000000e+00 : bf16
    %12 = vector.broadcast %cst_8 : bf16 to vector<1x16x128xbf16>
    %13 = vector.extract_strided_slice %10 {offsets = [0, 0, 0], sizes = [16, 15, 128], strides = [1, 1, 1]} : vector<16x16x128xbf16> to vector<16x15x128xbf16>
    %14 = tpu.concatenate %11, %13 in 1 : vector<16x1x128xbf16>, vector<16x15x128xbf16> -> vector<16x16x128xbf16>
    %15 = vector.extract_strided_slice %10 {offsets = [0, 1, 0], sizes = [16, 15, 128], strides = [1, 1, 1]} : vector<16x16x128xbf16> to vector<16x15x128xbf16>
    %16 = tpu.concatenate %15, %11 in 1 : vector<16x15x128xbf16>, vector<16x1x128xbf16> -> vector<16x16x128xbf16>
    %17 = tpu.concatenate %12, %14, %12 in 0 : vector<1x16x128xbf16>, vector<16x16x128xbf16>, vector<1x16x128xbf16> -> vector<18x16x128xbf16>
    %18 = tpu.concatenate %12, %10, %12 in 0 : vector<1x16x128xbf16>, vector<16x16x128xbf16>, vector<1x16x128xbf16> -> vector<18x16x128xbf16>
    %19 = tpu.concatenate %12, %16, %12 in 0 : vector<1x16x128xbf16>, vector<16x16x128xbf16>, vector<1x16x128xbf16> -> vector<18x16x128xbf16>
    %20 = vector.extract_strided_slice %17 {offsets = [0, 0, 0], sizes = [16, 16, 128], strides = [1, 1, 1]} : vector<18x16x128xbf16> to vector<16x16x128xbf16>
    %21 = vector.extract_strided_slice %18 {offsets = [0, 0, 0], sizes = [16, 16, 128], strides = [1, 1, 1]} : vector<18x16x128xbf16> to vector<16x16x128xbf16>
    %22 = vector.extract_strided_slice %19 {offsets = [0, 0, 0], sizes = [16, 16, 128], strides = [1, 1, 1]} : vector<18x16x128xbf16> to vector<16x16x128xbf16>
    %23 = vector.extract_strided_slice %17 {offsets = [1, 0, 0], sizes = [16, 16, 128], strides = [1, 1, 1]} : vector<18x16x128xbf16> to vector<16x16x128xbf16>
    %24 = vector.extract_strided_slice %18 {offsets = [1, 0, 0], sizes = [16, 16, 128], strides = [1, 1, 1]} : vector<18x16x128xbf16> to vector<16x16x128xbf16>
    %25 = vector.extract_strided_slice %19 {offsets = [1, 0, 0], sizes = [16, 16, 128], strides = [1, 1, 1]} : vector<18x16x128xbf16> to vector<16x16x128xbf16>
    %26 = vector.extract_strided_slice %17 {offsets = [2, 0, 0], sizes = [16, 16, 128], strides = [1, 1, 1]} : vector<18x16x128xbf16> to vector<16x16x128xbf16>
    %27 = vector.extract_strided_slice %18 {offsets = [2, 0, 0], sizes = [16, 16, 128], strides = [1, 1, 1]} : vector<18x16x128xbf16> to vector<16x16x128xbf16>
    %28 = vector.extract_strided_slice %19 {offsets = [2, 0, 0], sizes = [16, 16, 128], strides = [1, 1, 1]} : vector<18x16x128xbf16> to vector<16x16x128xbf16>
    %29 = tpu.concatenate %20, %21, %22, %23, %24, %25, %26, %27, %28 in 2 : vector<16x16x128xbf16>, vector<16x16x128xbf16>, vector<16x16x128xbf16>, vector<16x16x128xbf16>, vector<16x16x128xbf16>, vector<16x16x128xbf16>, vector<16x16x128xbf16>, vector<16x16x128xbf16>, vector<16x16x128xbf16> -> vector<16x16x1152xbf16>
    %30 = vector.shape_cast %29 : vector<16x16x1152xbf16> to vector<256x1152xbf16>
    %c0_9 = arith.constant 0 : index
    %c0_10 = arith.constant 0 : index
    %31 = vector.load %arg4[%c0_9, %c0_10] : memref<1152x128xbf16, #tpu.memory_space<vmem>>, vector<1152x128xbf16>
    %cst_11 = arith.constant dense<0.000000e+00> : vector<256x128xf32>
    %32 = tpu.matmul %30, %31, %cst_11 {dimension_numbers = #tpu.dot_dimension_numbers<[1], [0], [0], [1], [0, 0, 1, 1], [], []>} : vector<256x1152xbf16>, vector<1152x128xbf16>, vector<256x128xf32> -> vector<256x128xf32>
    %c0_12 = arith.constant 0 : index
    %c0_13 = arith.constant 0 : index
    %33 = vector.load %arg5[%c0_12, %c0_13] : memref<1x128xf32, #tpu.memory_space<vmem>>, vector<1x128xf32>
    %34 = vector.broadcast %33 : vector<1x128xf32> to vector<256x128xf32>
    %35 = arith.addf %32, %34 : vector<256x128xf32>
    %cst_14 = arith.constant 0.000000e+00 : f32
    %36 = vector.broadcast %cst_14 : f32 to vector<256x128xf32>
    %37 = arith.maximumf %35, %36 : vector<256x128xf32>
    %38 = vector.shape_cast %37 : vector<256x128xf32> to vector<16x16x128xf32>
    %39 = arith.truncf %38 : vector<16x16x128xf32> to vector<16x16x128xbf16>
    %c0_15 = arith.constant 0 : index
    %c0_16 = arith.constant 0 : index
    %c0_17 = arith.constant 0 : index
    %c0_18 = arith.constant 0 : index
    %40 = vector.load %arg6[%c0_15, %c0_16, %c0_17, %c0_18] : memref<1x16x16x128xbf16, #tpu.memory_space<vmem>>, vector<1x16x16x128xbf16>
    %41 = vector.shape_cast %40 : vector<1x16x16x128xbf16> to vector<16x16x128xbf16>
    %42 = vector.shape_cast %39 : vector<16x16x128xbf16> to vector<1x16x16x128xbf16>
    tpu.vector_store %arg6[%c0_15, %c0_16, %c0_17, %c0_18], %42 {strides = array<i32>} : memref<1x16x16x128xbf16, #tpu.memory_space<vmem>>, vector<1x16x16x128xbf16>,
    return
  }
  func.func @transform_0(%arg0: i32) -> (i32, i32, i32) {
    %c0_i32 = arith.constant 0 : i32
    %c0_i32_0 = arith.constant 0 : i32
    %c0_i32_1 = arith.constant 0 : i32
    return %arg0, %c0_i32, %c0_i32_0 : i32, i32, i32
  }
  func.func @transform_1(%arg0: i32) -> (i32, i32) {
    %c0_i32 = arith.constant 0 : i32
    %c0_i32_0 = arith.constant 0 : i32
    %c0_i32_1 = arith.constant 0 : i32
    return %c0_i32, %c0_i32_0 : i32, i32
  }
  func.func @transform_2(%arg0: i32) -> (i32, i32) {
    %c0_i32 = arith.constant 0 : i32
    %c0_i32_0 = arith.constant 0 : i32
    %c0_i32_1 = arith.constant 0 : i32
    return %c0_i32, %c0_i32_0 : i32, i32
  }
  func.func @transform_3(%arg0: i32) -> (i32, i32) {
    %c0_i32 = arith.constant 0 : i32
    %c0_i32_0 = arith.constant 0 : i32
    %c0_i32_1 = arith.constant 0 : i32
    return %c0_i32, %c0_i32_0 : i32, i32
  }
  func.func @transform_4(%arg0: i32) -> (i32, i32) {
    %c0_i32 = arith.constant 0 : i32
    %c0_i32_0 = arith.constant 0 : i32
    %c0_i32_1 = arith.constant 0 : i32
    return %c0_i32, %c0_i32_0 : i32, i32
  }
  func.func @transform_5(%arg0: i32) -> (i32, i32, i32, i32) {
    %c0_i32 = arith.constant 0 : i32
    %c0_i32_0 = arith.constant 0 : i32
    %c0_i32_1 = arith.constant 0 : i32
    %c0_i32_2 = arith.constant 0 : i32
    return %arg0, %c0_i32, %c0_i32_0, %c0_i32_1 : i32, i32, i32, i32
  }
}

</mosaic_0001>

<bundles_post_ra>
// kernel: down_block_forward.1
= control target key start
LH: loop header
LB: loop body
LE: loop exit
PB: predicated region body
PF: predicated region fallthrough
CT: control target
= control target key end

     0   :  { %s3489_s18 = smov 0   ;;  %s4438_s0 = inlined_call_operand.vmem [shape: bf16[2,256,128], index: 0, kind: input, shape index: {}]   ;;  %s4439_s1 = inlined_call_operand.vmem [shape: bf16[128,128], index: 1, kind: input, shape index: {}]   ;;  %s4440_s2 = inlined_call_operand.vmem [shape: f32[1,128], index: 2, kind: input, shape index: {}]   ;;  %s4441_s3 = inlined_call_operand.vmem [shape: bf16[1152,128], index: 3, kind: input, shape index: {}]   ;;  %s4442_s4 = inlined_call_operand.vmem [shape: f32[1,128], index: 4, kind: input, shape index: {}]   ;;  %s4443_s5 = inlined_call_operand.vmem [shape: bf16[2,16,16,128], index: 5, kind: output, shape index: {}]  }
   0x1 LB: > { %s2483_s19 = sadd.s32 4294967295, %s3456_s18   ;;  %p2487_p0 = scmp.ge.s32.totalorder %s3456_s18, 1  ;;  %s3456_s18 = sphi %s3489_s18, %s15_s18  }
   0x2   : > { %p187_p1 = scmp.lt.s32.totalorder %s3456_s18, 3 }
   0x4   : > { %p188_p2 = pnand %p2487_p0, %p187_p1 }
   0x5   : > { %v3354_v0 = vld [vmem:[%s4439_s1] sm:$0xff] (!%p188_p2)   ;;  %p215_p3 = scmp.lt.s32.totalorder (!%p188_p2), %s2483_s19, 1  ;;  %v3355_v1 = vld [vmem:[%s4439_s1 + $0x8] sm:$0xff] (!%p188_p2)   ;;  %v3356_v2 = vld [vmem:[%s4439_s1 + $0x10] sm:$0xff] (!%p188_p2)   ;;  %v3458_v51 = vmov (!%p188_p2), 0   ;;  %vm762_vm0 = vcmask (!%p188_p2), 1040384  }
   0x6   : > { %191 = sbr.rel (%p188_p2) target bundleno = 792 (0x318), region = 40  ;;  %3249 = vmatprep.subr.bf16.mxu0 (!%p188_p2), %v3354_v0  ;;  %v3357_v3 = vld [vmem:[%s4439_s1 + $0x18] sm:$0xff] (!%p188_p2)   ;;  %v3358_v5 = vld [vmem:[%s4439_s1 + $0x20] sm:$0xff] (!%p188_p2)   ;;  %v3359_v6 = vld [vmem:[%s4439_s1 + $0x28] sm:$0xff] (!%p188_p2)   ;;  %1463 = vmatprep.mubr.bf16.mxu1 (!%p188_p2), %v3458_v51  ;;  %vm763_vm1 = vsmask.f32 (!%p188_p2), 256 }
   0x7   : > { %3250 = vmatpush3.bf16.msra.mxu0 (!%p188_p2), %v3354_v0  ;;  %v3360_v7 = vld [vmem:[%s4439_s1 + $0x30] sm:$0xff] (!%p188_p2)   ;;  %v3361_v8 = vld [vmem:[%s4439_s1 + $0x38] sm:$0xff] (!%p188_p2)   ;;  %v3378_v9 = vld [vmem:[%s4441_s3 + $0x40] sm:$0xff] (!%p188_p2)   ;;  %vm829_vm3 = vcmask (!%p188_p2), 1047552   ;;  %vm830_vm4 = vsmask.f32 (!%p188_p2), 7424 }
   0x8   : > { %3251 = vmatprep.subr.bf16.mxu0 (!%p188_p2), %v3355_v1  ;;  %v3379_v10 = vld [vmem:[%s4441_s3] sm:$0xff] (!%p188_p2)   ;;  %2777 = vmatprep.subr.bf16.mxu1 (!%p188_p2), %v3378_v9  ;;  %v3380_v11 = vld [vmem:[%s4441_s3 + $0x48] sm:$0xff] (!%p188_p2)   ;;  %v3382_v14 = vld [vmem:[%s4441_s3 + $0x50] sm:$0xff] (!%p188_p2)  }
   0x9   : > { %2778 = vmatpush3.bf16.msra.mxu1 (!%p188_p2), %v3379_v10  ;;  %v3381_v12 = vld [vmem:[%s4441_s3 + $0x8] sm:$0xff] (!%p188_p2)   ;;  %v3383_v16 = vld [vmem:[%s4441_s3 + $0x10] sm:$0xff] (!%p188_p2)   ;;  %v3385_v17 = vld [vmem:[%s4441_s3 + $0xc0] sm:$0xff] (!%p188_p2)  }
   0xa   : > { %2779 = vmatprep.subr.bf16.mxu1 (!%p188_p2), %v3380_v11  ;;  %v3384_v18 = vld [vmem:[%s4441_s3 + $0x58] sm:$0xff] (!%p188_p2)   ;;  %v3387_v19 = vld [vmem:[%s4441_s3 + $0x80] sm:$0xff] (!%p188_p2)   ;;  %v3389_v21 = vld [vmem:[%s4441_s3 + $0xc8] sm:$0xff] (!%p188_p2)  }
   0xb   : > { %3252 = vmatpush3.bf16.msra.mxu0 (!%p188_p2), %v3355_v1  ;;  %v3386_v20 = vld [vmem:[%s4441_s3 + $0x18] sm:$0xff] (!%p188_p2)   ;;  %v3388_v23 = vld [vmem:[%s4441_s3 + $0x60] sm:$0xff] (!%p188_p2)   ;;  %v3391_v25 = vld [vmem:[%s4441_s3 + $0x88] sm:$0xff] (!%p188_p2)  }
   0xc   : > { %3253 = vmatprep.subr.bf16.mxu0 (!%p188_p2), %v3356_v2  ;;  %v3390_v26 = vld [vmem:[%s4441_s3 + $0x20] sm:$0xff] (!%p188_p2)   ;;  %v3393_v27 = vld [vmem:[%s4441_s3 + $0xd0] sm:$0xff] (!%p188_p2)   ;;  %v3392_v28 = vld [vmem:[%s4441_s3 + $0x68] sm:$0xff] (!%p188_p2)  }
   0xd   : > { %s4449_s19 = smov (!%p215_p3, %s2483_s19), 1  ;;  %2780 = vmatpush3.bf16.msra.mxu1 %v3381_v12  ;;  %v3395_v29 = vld [vmem:[%s4441_s3 + $0x90] sm:$0xff]   ;;  %v3394_v30 = vld [vmem:[%s4441_s3 + $0x28] sm:$0xff]   ;;  %v3397_v31 = vld [vmem:[%s4441_s3 + $0xd8] sm:$0xff]  }
   0xe   : > { %s2624_s26 = sshll.u32 %s4449_s19, 7  ;;  %2781 = vmatprep.subr.bf16.mxu1 %v3382_v14  ;;  %v3396_v33 = vld [vmem:[%s4441_s3 + $0x70] sm:$0xff]   ;;  %v3399_v36 = vld [vmem:[%s4441_s3 + $0x98] sm:$0xff]   ;;  %v3401_v47 = vld [vmem:[%s4441_s3 + $0xe0] sm:$0xff]  }
   0xf   : > { %s3514_s29 = scalar_lea.vmem %s4438_s0, %s2624_s26  ;;  %3254 = vmatpush3.bf16.msra.mxu0 %v3356_v2  ;;  %v3398_v35 = vld [vmem:[%s4441_s3 + $0x30] sm:$0xff]   ;;  %v3400_v46 = vld [vmem:[%s4441_s3 + $0x78] sm:$0xff]   ;;  %v3403_v49 = vld [vmem:[%s4441_s3 + $0xa0] sm:$0xff]   ;;  %s4387_s13 = scalar_lea.vmem %s4443_s5, %s2624_s26 }
  0x10   : > { %v3362_v4 = vld [vmem:[%s3514_s29] sm:$0xff]   ;;  %3255 = vmatprep.subr.bf16.mxu0 %v3357_v3  ;;  %v3363_v13 = vld [vmem:[%s3514_s29 + $0x8] sm:$0xff]   ;;  %v3364_v15 = vld [vmem:[%s3514_s29 + $0x10] sm:$0xff]  }
  0x11   : > { %3265 = vmatprep.mubr.bf16.mxu0 %v3362_v4  ;;  %2782 = vmatpush3.bf16.msra.mxu1 %v3383_v16  ;;  %v3365_v22 = vld [vmem:[%s3514_s29 + $0x18] sm:$0xff]   ;;  %v3366_v24 = vld [vmem:[%s3514_s29 + $0x20] sm:$0xff]   ;;  %v3367_v32 = vld [vmem:[%s3514_s29 + $0x28] sm:$0xff]  }
  0x12   : > { %2783 = vmatprep.subr.bf16.mxu1 %v3384_v18  ;;  %v3368_v34 = vld [vmem:[%s3514_s29 + $0x30] sm:$0xff]   ;;  %v3369_v37 = vld [vmem:[%s3514_s29 + $0x38] sm:$0xff]   ;;  %v3370_v38 = vld [vmem:[%s3514_s29 + $0x40] sm:$0xff]  }
  0x13   : > { %3256 = vmatpush3.bf16.msra.mxu0 %v3357_v3  ;;  %v3371_v39 = vld [vmem:[%s3514_s29 + $0x48] sm:$0xff]   ;;  %v3372_v40 = vld [vmem:[%s3514_s29 + $0x50] sm:$0xff]   ;;  %v3373_v41 = vld [vmem:[%s3514_s29 + $0x58] sm:$0xff]  }
  0x14   : > { %3257 = vmatprep.subr.bf16.mxu0 %v3358_v5  ;;  %v3374_v42 = vld [vmem:[%s3514_s29 + $0x60] sm:$0xff]   ;;  %v3375_v43 = vld [vmem:[%s3514_s29 + $0x68] sm:$0xff]   ;;  %v3376_v44 = vld [vmem:[%s3514_s29 + $0x70] sm:$0xff]  }
  0x15   : > { %2784 = vmatpush3.bf16.msra.mxu1 %v3386_v20  ;;  %v3377_v45 = vld [vmem:[%s3514_s29 + $0x78] sm:$0xff]   ;;  %v3404_v50 = vld [vmem:[%s4441_s3 + $0xe8] sm:$0xff]   ;;  %v3406_v53 = vld [vmem:[%s4441_s3 + $0x140] sm:$0xff]  }
  0x16   : > { %2785 = vmatprep.subr.bf16.mxu1 %v3388_v23  ;;  %v3402_v48 = vld [vmem:[%s4441_s3 + $0x38] sm:$0xff]   ;;  %v3405_v52 = vld [vmem:[%s4441_s3 + $0xa8] sm:$0xff]   ;;  %v3407_v54 = vld [vmem:[%s4441_s3 + $0x100] sm:$0xff]  }
  0x17   : > { %3258 = vmatpush3.bf16.msra.mxu0 %v3358_v5  ;;  %v3408_v55 = vld [vmem:[%s4441_s3 + $0xf0] sm:$0xff]   ;;  %v3410_v57 = vld [vmem:[%s4441_s3 + $0xf8] sm:$0xff]   ;;  %v3412_v59 = vld [vmem:[%s4441_s3 + $0x148] sm:$0xff]  }
  0x18   : > { %3259 = vmatprep.subr.bf16.mxu0 %v3359_v6  ;;  %v3409_v56 = vld [vmem:[%s4441_s3 + $0xb0] sm:$0xff]   ;;  %v3411_v58 = vld [vmem:[%s4441_s3 + $0xb8] sm:$0xff]   ;;  %v3413_v60 = vld [vmem:[%s4441_s3 + $0x108] sm:$0xff]  }
  0x19   : > { %2786 = vmatpush3.bf16.msra.mxu1 %v3390_v26  ;;  %v3414_v61 = vld [vmem:[%s4441_s3 + $0x150] sm:$0xff]   ;;  %v3416_v63 = vld [vmem:[%s4441_s3 + $0x158] sm:$0xff]   ;;  %v3418_v1 = vld [vmem:[%s4441_s3 + $0x1c0] sm:$0xff]  }
  0x1a   : > { %2787 = vmatprep.subr.bf16.mxu1 %v3392_v28  ;;  %v3415_v62 = vld [vmem:[%s4441_s3 + $0x110] sm:$0xff]   ;;  %v3417_v0 = vld [vmem:[%s4441_s3 + $0x118] sm:$0xff]   ;;  %v3420_v2 = vld [vmem:[%s4441_s3 + $0x160] sm:$0xff]  }
  0x1b   : > { %3260 = vmatpush3.bf16.msra.mxu0 %v3359_v6  ;;  %v3421_v3 = vld [vmem:[%s4441_s3 + $0x120] sm:$0xff]   ;;  %v3424_v4 = vld [vmem:[%s4441_s3 + $0x168] sm:$0xff]   ;;  %v3428_v6 = vld [vmem:[%s4441_s3 + $0x170] sm:$0xff]  }
  0x1c   : > { %3261 = vmatprep.subr.bf16.mxu0 %v3360_v7  ;;  %v3425_v5 = vld [vmem:[%s4441_s3 + $0x128] sm:$0xff]   ;;  %v3433_v9 = vld [vmem:[%s4441_s3 + $0x138] sm:$0xff]   ;;  %v3699_v10 = vld [vmem:[%s4440_s2] ss:$0 sm:$0xff] }
  0x1d   : > { %2788 = vmatpush3.bf16.msra.mxu1 %v3394_v30  ;;  %v3707_v18 = vld [vmem:[%s4441_s3 + $0x200] sm:$0xff]   ;;  %vm3726_vm2 = vmand %vm762_vm0, %vm763_vm1 }
  0x1e   : > { %2789 = vmatprep.subr.bf16.mxu1 %v3396_v33  ;;  %vm3764_vm5 = vmand %vm829_vm3, %vm830_vm4 }
  0x1f   : > { %3262 = vmatpush3.bf16.msra.mxu0 %v3360_v7  ;;  %v3429_v7 = vld [vmem:[%s4441_s3 + $0x130] sm:$0xff]  }
  0x20   : > { %3263 = vmatprep.subr.bf16.mxu0 %v3361_v8 }
  0x21   : > { %2790 = vmatpush3.bf16.msra.mxu1 %v3398_v35 }
  0x22   : > { %2791 = vmatprep.subr.bf16.mxu1 %v3400_v46 }
  0x23   : > { %3264 = vmatpush3.bf16.msra.mxu0 %v3361_v8  ;;  %v3432_v8 = vld [vmem:[%s4441_s3 + $0x178] sm:$0xff]  }
  0x24   : > { %2889 = vmatprep.subr.bf16.mxu0 %v3385_v17 }
  0x25   : > { %2792 = vmatpush3.bf16.msra.mxu1 %v3402_v48  ;;  %v3419_v48 = vld [vmem:[%s4441_s3 + $0x180] sm:$0xff]  }
  0x26   : > { %3266 = vmatmul.mubr.bf16.vlgmr.msra.gmra.mrb[0].mxu0 %v3363_v13  ;;  %3001 = vmatprep.subr.bf16.mxu1 %v3406_v53  ;;  %v3422_v53 = vld [vmem:[%s4441_s3 + $0x1c8] sm:$0xff]  }
  0x27   : > { %3269 = vmatprep.mubr.bf16.mxu0 %v3364_v15  ;;  %2890 = vmatpush3.bf16.msra.mxu0 %v3387_v19 }
  0x28   : > { %2891 = vmatprep.subr.bf16.mxu0 %v3389_v21  ;;  %1464 = vmatmul.mubr.bf16.vlgmr.msra.gmra.mrb[0].mxu1 %v3458_v51 }
  0x29   : > { %3002 = vmatpush3.bf16.msra.mxu1 %v3407_v54 }
  0x2a   : > { %3003 = vmatprep.subr.bf16.mxu1 %v3412_v59 }
  0x2b   : > { %2892 = vmatpush3.bf16.msra.mxu0 %v3391_v25 }
  0x2c   : > { %2893 = vmatprep.subr.bf16.mxu0 %v3393_v27 }
  0x2d   : > { %3004 = vmatpush3.bf16.msra.mxu1 %v3413_v60 }
  0x2e   : > { %3270 = vmatmul.mubr.bf16.gmra.mrb[4].mxu0 %v3365_v22  ;;  %3005 = vmatprep.subr.bf16.mxu1 %v3414_v61 }
  0x2f   : > { %3273 = vmatprep.mubr.bf16.mxu0 %v3366_v24  ;;  %2894 = vmatpush3.bf16.msra.mxu0 %v3395_v29 }
  0x30   : > { %2895 = vmatprep.subr.bf16.mxu0 %v3397_v31 }
  0x31   : > { %3006 = vmatpush3.bf16.msra.mxu1 %v3415_v62 }
  0x32   : > { %3007 = vmatprep.subr.bf16.mxu1 %v3416_v63 }
  0x33   : > { %2896 = vmatpush3.bf16.msra.mxu0 %v3399_v36 }
  0x34   : > { %2897 = vmatprep.subr.bf16.mxu0 %v3401_v47 }
  0x35   : > { %3008 = vmatpush3.bf16.msra.mxu1 %v3417_v0  ;;  %v3423_v0 = vld [vmem:[%s4441_s3 + $0x188] sm:$0xff]  }
  0x36   : > { %3274 = vmatmul.mubr.bf16.gmra.mrb[8].mxu0 %v3367_v32  ;;  %3009 = vmatprep.subr.bf16.mxu1 %v3420_v2 }
  0x37   : > { %3277 = vmatprep.mubr.bf16.mxu0 %v3368_v34  ;;  %2898 = vmatpush3.bf16.msra.mxu0 %v3403_v49 }
  0x38   : > { %2899 = vmatprep.subr.bf16.mxu0 %v3404_v50 }
  0x39   : > { %3010 = vmatpush3.bf16.msra.mxu1 %v3421_v3 }
  0x3a   : > { %3011 = vmatprep.subr.bf16.mxu1 %v3424_v4 }
  0x3b   : > { %2900 = vmatpush3.bf16.msra.mxu0 %v3405_v52 }
  0x3c   : > { %2901 = vmatprep.subr.bf16.mxu0 %v3408_v55 }
  0x3d   : > { %3012 = vmatpush3.bf16.msra.mxu1 %v3425_v5  ;;  %v3426_v5 = vld [vmem:[%s4441_s3 + $0x1d0] sm:$0xff]  }
  0x3e   : > { %3278 = vmatmul.mubr.bf16.gmra.mrb[12].mxu0 %v3369_v37  ;;  %3013 = vmatprep.subr.bf16.mxu1 %v3428_v6 }
  0x3f   : > { %3281 = vmatprep.mubr.bf16.mxu0 %v3370_v38  ;;  %2902 = vmatpush3.bf16.msra.mxu0 %v3409_v56 }
  0x40   : > { %2903 = vmatprep.subr.bf16.mxu0 %v3410_v57 }
  0x41   : > { %3014 = vmatpush3.bf16.msra.mxu1 %v3429_v7 }
  0x42   : > { %3015 = vmatprep.subr.bf16.mxu1 %v3432_v8  ;;  %v3447_v8 = vld [vmem:[%s4441_s3 + $0x228] sm:$0xff]  }
  0x43   : > { %2904 = vmatpush3.bf16.msra.mxu0 %v3411_v58 }
  0x44   : > { %3113 = vmatprep.subr.bf16.mxu0 %v3418_v1 }
  0x45   : > { %3016 = vmatpush3.bf16.msra.mxu1 %v3433_v9 }
  0x46   : > { %3282 = vmatmul.mubr.bf16.gmra.mrb[16].mxu0 %v3371_v39  ;;  %3297 = vmatprep.subr.bf16.mxu1 %v3707_v18 }
  0x47   : > { %3285 = vmatprep.mubr.bf16.mxu0 %v3372_v40 }
  0x4e   : > { %3286 = vmatmul.mubr.bf16.gmra.mrb[20].mxu0 %v3373_v41 }
  0x4f   : > { %3289 = vmatprep.mubr.bf16.mxu0 %v3374_v42 }
  0x56   : > { %3290 = vmatmul.mubr.bf16.gmra.mrb[24].mxu0 %v3375_v43  ;;  %v3444_v43 = vld [vmem:[%s4441_s3 + $0x210] sm:$0xff]  }
  0x57   : > { %3293 = vmatprep.mubr.bf16.mxu0 %v3376_v44 }
  0x5e   : > { %3294 = vmatmul.mubr.bf16.gmra.mrb[28].mxu0 %v3377_v45 }
  0xf9   : > { %v3267_v11 = vpop.f32.mrb[0].mxu0 }
  0xfa   : > { %v468_v12 = vadd.f32 %v3267_v11, %v3699_v10  ;;  %v459_v13 = vpop.f32.mrb[1].mxu0 }
  0xfb   : > { %v460_v14 = vadd.f32 %v3699_v10, %v459_v13  ;;  %v3268_v15 = vpop.f32.mrb[2].mxu0 }
  0xfc   : > { %v471_v16 = vadd.f32 %v3268_v15, %v3699_v10  ;;  %v462_v17 = vpop.f32.mrb[3].mxu0  ;;  %v588_v20 = vmax.f32 %v468_v12, 0.0 }
  0xfd   : > { %v463_v19 = vadd.f32 %v3699_v10, %v462_v17  ;;  %v586_v22 = vmax.f32 %v460_v14, 0.0  ;;  %v3427_v14 = vld [vmem:[%s4441_s3 + $0x190] sm:$0xff]  }
  0xfe   : > { %v589_v21 = vmax.f32 %v471_v16, 0.0 }
  0xff   : > { %v587_v23 = vmax.f32 %v463_v19, 0.0  ;;  %v3430_v19 = vld [vmem:[%s4441_s3 + $0x1d8] sm:$0xff]  }
 0x100   : > { %v3711_v24 = vpack.c.bf16 %v589_v21, %v588_v20 }
 0x101   : > { %v3713_v25 = vpack.c.bf16 %v587_v23, %v586_v22  ;;  %v3271_v26 = vpop.f32.mrb[4].mxu0 }
 0x102   : > { %v484_v27 = vadd.f32 %v3271_v26, %v3699_v10  ;;  %v475_v28 = vpop.f32.mrb[5].mxu0  ;;  %v642_v29 = vshrl.u32 %v3711_v24, 16  ;;  %v645_v37 = vshll.u32 %v3711_v24, 16 }
 0x103   : > { %1471 = vmatprep.mubr.bf16.mxu1 %v3713_v25  ;;  %v476_v30 = vadd.f32 %v3699_v10, %v475_v28  ;;  %v3272_v31 = vpop.f32.mrb[6].mxu0  ;;  %v635_v32 = vshrl.u32 %v3713_v25, 16  ;;  %v638_v41 = vshll.u32 %v3713_v25, 16 }
 0x104   : > { %v592_v33 = vmax.f32 %v484_v27, 0.0  ;;  %v487_v34 = vadd.f32 %v3272_v31, %v3699_v10  ;;  %v478_v35 = vpop.f32.mrb[7].mxu0  ;;  %v644_v36 = vrot.slane %v642_v29, 7  ;;  %v783_v21 = vrot.slane %v645_v37, 1 }
 0x105   : > { %v590_v38 = vmax.f32 %v476_v30, 0.0  ;;  %v479_v39 = vadd.f32 %v3699_v10, %v478_v35  ;;  %v637_v40 = vrot.slane %v635_v32, 7  ;;  %v781_v54 = vrot.slane %v638_v41, 1 }
 0x106   : > { %v593_v42 = vmax.f32 %v487_v34, 0.0  ;;  %v647_v46 = vor.u32 %v645_v37, %v644_v36 }
 0x107   : > { %v591_v44 = vmax.f32 %v479_v39, 0.0  ;;  %v640_v45 = vor.u32 %v638_v41, %v637_v40  ;;  %v782_v6 = vor.u32 %v781_v54, %v635_v32  ;;  %v784_v39 = vor.u32 %v783_v21, %v642_v29  ;;  %v3436_v29 = vld [vmem:[%s4441_s3 + $0x1e8] sm:$0xff]  }
 0x108   : > { %v3730_v47 = vpack.c.bf16 %v593_v42, %v592_v33  ;;  %v3747_v57 = vsel %vm3726_vm2, 0, %v647_v46  ;;  %v3431_v33 = vld [vmem:[%s4441_s3 + $0x198] sm:$0xff]  }
 0x109   : > { %v3735_v49 = vpack.c.bf16 %v591_v44, %v590_v38  ;;  %v765_v50 = vsel %vm3726_vm2, 0, %v640_v45  ;;  %v3275_v52 = vpop.f32.mrb[8].mxu0  ;;  %v3786_v20 = vsel %vm3764_vm5, %v782_v6, 0  ;;  %v3434_v38 = vld [vmem:[%s4441_s3 + $0x1e0] sm:$0xff]  }
 0x10a   : > { %1472 = vmatmul.mubr.bf16.gmra.mrb[4].mxu1 %v765_v50  ;;  %1624 = vmatprep.mubr.bf16.mxu0 %v765_v50  ;;  %v500_v55 = vadd.f32 %v3275_v52, %v3699_v10  ;;  %v491_v56 = vpop.f32.mrb[9].mxu0  ;;  %v656_v12 = vshrl.u32 %v3730_v47, 16  ;;  %v659_v34 = vshll.u32 %v3730_v47, 16  ;;  %v3435_v45 = vld [vmem:[%s4441_s3 + $0x1a0] sm:$0xff]   ;;  %v3822_v52 = vsel %vm3764_vm5, %v784_v39, 0 }
 0x10b   : > { %1479 = vmatprep.mubr.bf16.mxu1 %v3711_v24  ;;  %1625 = vmatmul.mubr.bf16.vlgmr.msra.gmra.mrb[32].mxu0 %v3458_v51  ;;  %v492_v58 = vadd.f32 %v3699_v10, %v491_v56  ;;  %v649_v59 = vshrl.u32 %v3735_v49, 16  ;;  %v3276_v60 = vpop.f32.mrb[10].mxu0  ;;  %v652_v3 = vshll.u32 %v3735_v49, 16 }
 0x10c   : > { %1632 = vmatprep.mubr.bf16.mxu0 %v3747_v57  ;;  %v596_v61 = vmax.f32 %v500_v55, 0.0  ;;  %v503_v62 = vadd.f32 %v3276_v60, %v3699_v10  ;;  %v494_v63 = vpop.f32.mrb[11].mxu0  ;;  %3114 = vmatpush3.bf16.msra.mxu0 %v3419_v48  ;;  %v658_v26 = vrot.slane %v656_v12, 7 }
 0x10d   : > { %v594_v1 = vmax.f32 %v492_v58, 0.0  ;;  %v651_v2 = vrot.slane %v649_v59, 7  ;;  %v495_v4 = vadd.f32 %v3699_v10, %v494_v63  ;;  %3115 = vmatprep.subr.bf16.mxu0 %v3422_v53  ;;  %v785_v53 = vrot.slane %v652_v3, 1 }
 0x10e   : > { %v597_v7 = vmax.f32 %v503_v62, 0.0  ;;  %v661_v41 = vor.u32 %v659_v34, %v658_v26  ;;  %v787_v26 = vrot.slane %v659_v34, 1  ;;  %v3442_v34 = vld [vmem:[%s4441_s3 + $0x1b8] sm:$0xff]  }
 0x10f   : > { %v654_v9 = vor.u32 %v652_v3, %v651_v2  ;;  %v595_v11 = vmax.f32 %v495_v4, 0.0  ;;  %v786_v6 = vor.u32 %v785_v53, %v649_v59  ;;  %v3441_v59 = vld [vmem:[%s4441_s3 + $0x1f8] sm:$0xff]  }
 0x110   : > { %v3769_v13 = vpack.c.bf16 %v597_v7, %v596_v61  ;;  %3116 = vmatpush3.bf16.msra.mxu0 %v3423_v0  ;;  %v3829_v56 = vsel %vm3726_vm2, 0, %v661_v41 }
 0x111   : > { %v3776_v15 = vsel %vm3726_vm2, 0, %v654_v9  ;;  %v3778_v16 = vpack.c.bf16 %v595_v11, %v594_v1  ;;  %v3279_v17 = vpop.f32.mrb[12].mxu0  ;;  %3117 = vmatprep.subr.bf16.mxu0 %v3426_v5  ;;  %v3437_v1 = vld [vmem:[%s4441_s3 + $0x1a8] sm:$0xff]   ;;  %v3439_v5 = vld [vmem:[%s4441_s3 + $0x1f0] sm:$0xff]  }
 0x112   : > { %1480 = vmatmul.mubr.bf16.gmra.mrb[8].mxu1 %v3747_v57  ;;  %v516_v22 = vadd.f32 %v3279_v17, %v3699_v10  ;;  %v507_v23 = vpop.f32.mrb[13].mxu0  ;;  %v670_v9 = vshrl.u32 %v3769_v13, 16  ;;  %v3440_v17 = vld [vmem:[%s4441_s3 + $0x1b0] sm:$0xff]  }
 0x113   : > { %1487 = vmatprep.mubr.bf16.mxu1 %v3735_v49  ;;  %1633 = vmatmul.mubr.bf16.gmra.mrb[36].mxu0 %v3786_v20  ;;  %v508_v27 = vadd.f32 %v3699_v10, %v507_v23  ;;  %v3280_v28 = vpop.f32.mrb[14].mxu0  ;;  %v663_v36 = vshrl.u32 %v3778_v16, 16  ;;  %v666_v58 = vshll.u32 %v3778_v16, 16  ;;  %v3862_v23 = vsel %vm3764_vm5, %v786_v6, 0 }
 0x114   : > { %1640 = vmatprep.mubr.bf16.mxu0 %v3776_v15  ;;  %v600_v30 = vmax.f32 %v516_v22, 0.0  ;;  %v519_v31 = vadd.f32 %v3280_v28, %v3699_v10  ;;  %v510_v32 = vpop.f32.mrb[15].mxu0  ;;  %3118 = vmatpush3.bf16.msra.mxu0 %v3427_v14 }
 0x115   : > { %v598_v35 = vmax.f32 %v508_v27, 0.0  ;;  %v511_v37 = vadd.f32 %v3699_v10, %v510_v32  ;;  %3119 = vmatprep.subr.bf16.mxu0 %v3430_v19  ;;  %v665_v46 = vrot.slane %v663_v36, 7 }
 0x116   : > { %v601_v40 = vmax.f32 %v519_v31, 0.0 }
 0x117   : > { %v599_v42 = vmax.f32 %v511_v37, 0.0  ;;  %v668_v2 = vor.u32 %v666_v58, %v665_v46 }
 0x118   : > { %v3807_v44 = vpack.c.bf16 %v601_v40, %v600_v30  ;;  %3120 = vmatpush3.bf16.msra.mxu0 %v3431_v33  ;;  %v672_v30 = vrot.slane %v670_v9, 7 }
 0x119   : > { %v3814_v48 = vpack.c.bf16 %v599_v42, %v598_v35  ;;  %v3283_v50 = vpop.f32.mrb[16].mxu0  ;;  %3121 = vmatprep.subr.bf16.mxu0 %v3434_v38  ;;  %v3852_v19 = vsel %vm3726_vm2, 0, %v668_v2  ;;  %v673_v38 = vshll.u32 %v3769_v13, 16  ;;  %v788_v42 = vor.u32 %v787_v26, %v656_v12 }
 0x11a   : > { %1488 = vmatmul.mubr.bf16.gmra.mrb[12].mxu1 %v3776_v15  ;;  %v532_v54 = vadd.f32 %v3283_v50, %v3699_v10  ;;  %v523_v55 = vpop.f32.mrb[17].mxu0 }
 0x11b   : > { %1495 = vmatprep.mubr.bf16.mxu1 %v3730_v47  ;;  %1641 = vmatmul.mubr.bf16.gmra.mrb[40].mxu0 %v3822_v52  ;;  %v524_v60 = vadd.f32 %v3699_v10, %v523_v55  ;;  %v3284_v61 = vpop.f32.mrb[18].mxu0  ;;  %v677_v39 = vshrl.u32 %v3814_v48, 16  ;;  %v675_v46 = vor.u32 %v673_v38, %v672_v30 }
 0x11c   : > { %1648 = vmatprep.mubr.bf16.mxu0 %v3829_v56  ;;  %v604_v62 = vmax.f32 %v532_v54, 0.0  ;;  %v535_v63 = vadd.f32 %v3284_v61, %v3699_v10  ;;  %v526_v0 = vpop.f32.mrb[19].mxu0  ;;  %3122 = vmatpush3.bf16.msra.mxu0 %v3435_v45  ;;  %v789_v61 = vrot.slane %v666_v58, 1 }
 0x11d   : > { %v602_v3 = vmax.f32 %v524_v60, 0.0  ;;  %v527_v4 = vadd.f32 %v3699_v10, %v526_v0  ;;  %3123 = vmatprep.subr.bf16.mxu0 %v3436_v29  ;;  %v679_v53 = vrot.slane %v677_v39, 7  ;;  %v3889_v60 = vsel %vm3764_vm5, %v788_v42, 0 }
 0x11e   : > { %v605_v7 = vmax.f32 %v535_v63, 0.0  ;;  %v3896_v63 = vsel %vm3726_vm2, 0, %v675_v46  ;;  %v680_v0 = vshll.u32 %v3814_v48, 16 }
 0x11f   : > { %v603_v11 = vmax.f32 %v527_v4, 0.0 }
 0x120   : > { %v3845_v14 = vpack.c.bf16 %v605_v7, %v604_v62  ;;  %3124 = vmatpush3.bf16.msra.mxu0 %v3437_v1 }
 0x121   : > { %v3854_v21 = vpack.c.bf16 %v603_v11, %v602_v3  ;;  %v3287_v22 = vpop.f32.mrb[20].mxu0  ;;  %3125 = vmatprep.subr.bf16.mxu0 %v3439_v5  ;;  %v682_v5 = vor.u32 %v680_v0, %v679_v53  ;;  %v790_v11 = vor.u32 %v789_v61, %v663_v36  ;;  %v791_v36 = vrot.slane %v673_v38, 1 }
 0x122   : > { %1496 = vmatmul.mubr.bf16.gmra.mrb[16].mxu1 %v3829_v56  ;;  %v548_v27 = vadd.f32 %v3287_v22, %v3699_v10  ;;  %v539_v28 = vpop.f32.mrb[21].mxu0  ;;  %v684_v22 = vshrl.u32 %v3807_v44, 16 }
 0x123   : > { %1503 = vmatprep.mubr.bf16.mxu1 %v3778_v16  ;;  %1649 = vmatmul.mubr.bf16.gmra.mrb[44].mxu0 %v3862_v23  ;;  %v540_v31 = vadd.f32 %v3699_v10, %v539_v28  ;;  %v3288_v32 = vpop.f32.mrb[22].mxu0  ;;  %v691_v38 = vshrl.u32 %v3854_v21, 16  ;;  %v792_v53 = vor.u32 %v791_v36, %v670_v9 }
 0x124   : > { %1656 = vmatprep.mubr.bf16.mxu0 %v3852_v19  ;;  %v608_v33 = vmax.f32 %v548_v27, 0.0  ;;  %v551_v35 = vadd.f32 %v3288_v32, %v3699_v10  ;;  %v542_v37 = vpop.f32.mrb[23].mxu0  ;;  %3126 = vmatpush3.bf16.msra.mxu0 %v3440_v17  ;;  %v3910_v27 = vsel %vm3726_vm2, 0, %v682_v5 }
 0x125   : > { %v606_v40 = vmax.f32 %v540_v31, 0.0  ;;  %v543_v41 = vadd.f32 %v3699_v10, %v542_v37  ;;  %3127 = vmatprep.subr.bf16.mxu0 %v3441_v59  ;;  %v3917_v31 = vsel %vm3764_vm5, %v790_v11, 0 }
 0x126   : > { %v609_v45 = vmax.f32 %v551_v35, 0.0  ;;  %v686_v35 = vrot.slane %v684_v22, 7 }
 0x127   : > { %v607_v50 = vmax.f32 %v543_v41, 0.0 }
 0x128   : > { %v3880_v29 = vpack.c.bf16 %v609_v45, %v608_v33  ;;  %3128 = vmatpush3.bf16.msra.mxu0 %v3442_v34  ;;  %v687_v45 = vshll.u32 %v3807_v44, 16 }
 0x129   : > { %v3884_v54 = vpack.c.bf16 %v607_v50, %v606_v40  ;;  %v3291_v55 = vpop.f32.mrb[24].mxu0 }
 0x12a   : > { %1504 = vmatmul.mubr.bf16.gmra.mrb[20].mxu1 %v3852_v19  ;;  %v564_v12 = vadd.f32 %v3291_v55, %v3699_v10  ;;  %v555_v62 = vpop.f32.mrb[25].mxu0  ;;  %v689_v61 = vor.u32 %v687_v45, %v686_v35 }
 0x12b   : > { %1511 = vmatprep.mubr.bf16.mxu1 %v3769_v13  ;;  %1657 = vmatmul.mubr.bf16.gmra.mrb[48].mxu0 %v3889_v60  ;;  %v556_v1 = vadd.f32 %v3699_v10, %v555_v62  ;;  %v3292_v2 = vpop.f32.mrb[26].mxu0  ;;  %v705_v35 = vshrl.u32 %v3884_v54, 16 }
 0x12c   : > { %1664 = vmatprep.mubr.bf16.mxu0 %v3896_v63  ;;  %v612_v3 = vmax.f32 %v564_v12, 0.0  ;;  %v567_v58 = vadd.f32 %v3292_v2, %v3699_v10  ;;  %v558_v4 = vpop.f32.mrb[27].mxu0  ;;  %v3944_v9 = vsel %vm3726_vm2, 0, %v689_v61 }
 0x12d   : > { %v610_v6 = vmax.f32 %v556_v1, 0.0  ;;  %v559_v7 = vadd.f32 %v3699_v10, %v558_v4  ;;  %v693_v1 = vrot.slane %v691_v38, 7  ;;  %v694_v4 = vshll.u32 %v3854_v21, 16 }
 0x12e   : > { %v613_v17 = vmax.f32 %v567_v58, 0.0  ;;  %v793_v58 = vrot.slane %v680_v0, 1 }
 0x12f   : > { %v611_v59 = vmax.f32 %v559_v7, 0.0  ;;  %v696_v0 = vor.u32 %v694_v4, %v693_v1  ;;  %v2793_v1 = vpop.f32.mrb[0].mxu1 }
 0x130   : > { %v3906_v26 = vpack.c.bf16 %v613_v17, %v612_v3  ;;  %v3937_v3 = vsel %vm3764_vm5, %v792_v53, 0  ;;  %v794_v7 = vor.u32 %v793_v58, %v677_v39  ;;  %v698_v17 = vshrl.u32 %v3845_v14, 16 }
 0x131   : > { %v3912_v28 = vpack.c.bf16 %v611_v59, %v610_v6  ;;  %v3295_v30 = vpop.f32.mrb[28].mxu0  ;;  %v795_v39 = vrot.slane %v687_v45, 1  ;;  %v712_v53 = vshrl.u32 %v3880_v29, 16 }
 0x132   : > { %1512 = vmatmul.mubr.bf16.gmra.mrb[24].mxu1 %v3896_v63  ;;  %v580_v32 = vadd.f32 %v3295_v30, %v3699_v10  ;;  %v571_v33 = vpop.f32.mrb[29].mxu0  ;;  %v3962_v30 = vsel %vm3726_vm2, 0, %v696_v0  ;;  %v3967_v36 = vsel %vm3764_vm5, %v794_v7, 0  ;;  %v715_v0 = vshll.u32 %v3880_v29, 16 }
 0x133   : > { %1519 = vmatprep.mubr.bf16.mxu1 %v3814_v48  ;;  %1665 = vmatmul.mubr.bf16.gmra.mrb[52].mxu0 %v3917_v31  ;;  %v572_v37 = vadd.f32 %v3699_v10, %v571_v33  ;;  %v3296_v34 = vpop.f32.mrb[30].mxu0  ;;  %v701_v33 = vshll.u32 %v3845_v14, 16  ;;  %v714_v58 = vrot.slane %v712_v53, 7  ;;  %v719_v7 = vshrl.u32 %v3912_v28, 16 }
 0x134   : > { %1672 = vmatprep.mubr.bf16.mxu0 %v3910_v27  ;;  %v616_v40 = vmax.f32 %v580_v32, 0.0  ;;  %v583_v41 = vadd.f32 %v3296_v34, %v3699_v10  ;;  %v574_v42 = vpop.f32.mrb[31].mxu0  ;;  %v700_v32 = vrot.slane %v698_v17, 7 }
 0x135   : > { %v614_v46 = vmax.f32 %v572_v37, 0.0  ;;  %v575_v50 = vadd.f32 %v3699_v10, %v574_v42  ;;  %v796_v37 = vor.u32 %v795_v39, %v684_v22  ;;  %v797_v42 = vrot.slane %v694_v4, 1 }
 0x136   : > { %v617_v55 = vmax.f32 %v583_v41, 0.0  ;;  %v703_v34 = vor.u32 %v701_v33, %v700_v32 }
 0x137   : > { %v615_v12 = vmax.f32 %v575_v50, 0.0  ;;  %v3977_v41 = vsel %vm3764_vm5, %v796_v37, 0  ;;  %v798_v50 = vor.u32 %v797_v42, %v691_v38  ;;  %v2794_v38 = vpop.f32.mrb[1].mxu1  ;;  %v721_v37 = vrot.slane %v719_v7, 7 }
 0x138   : > { %v3930_v62 = vpack.c.bf16 %v617_v55, %v616_v40  ;;  %v707_v40 = vrot.slane %v705_v35, 7  ;;  %v3983_v45 = vsel %vm3726_vm2, 0, %v703_v34  ;;  %v4000_v4 = vadd.f32 %v2794_v38, %v2793_v1 }
 0x139   : > { %v3932_v2 = vpack.c.bf16 %v615_v12, %v614_v46  ;;  %v708_v46 = vshll.u32 %v3884_v54, 16  ;;  %v3995_v61 = vsel %vm3764_vm5, %v798_v50, 0  ;;  %v799_v12 = vrot.slane %v701_v33, 1 }
 0x13a   : > { %1520 = vmatmul.mubr.bf16.gmra.mrb[28].mxu1 %v3910_v27  ;;  %v743_v10 = vshll.u32 %v3930_v62, 16  ;;  %v740_v5 = vshrl.u32 %v3930_v62, 16  ;;  %v717_v33 = vor.u32 %v715_v0, %v714_v58  ;;  %v803_v58 = vrot.slane %v715_v0, 1 }
 0x13b   : > { %1527 = vmatprep.mubr.bf16.mxu1 %v3807_v44  ;;  %1673 = vmatmul.mubr.bf16.gmra.mrb[56].mxu0 %v3937_v3  ;;  %v710_v22 = vor.u32 %v708_v46, %v707_v40  ;;  %v800_v39 = vor.u32 %v799_v12, %v698_v17  ;;  %v801_v40 = vrot.slane %v708_v46, 1  ;;  %v722_v17 = vshll.u32 %v3912_v28, 16 }
 0x13c   : > { %1680 = vmatprep.mubr.bf16.mxu0 %v3944_v9  ;;  %v811_v6 = vrot.slane %v743_v10, 1  ;;  %v4015_v42 = vsel %vm3726_vm2, 0, %v717_v33  ;;  %v726_v12 = vshrl.u32 %v3906_v26, 16 }
 0x13d   : > { %v3990_v55 = vsel %vm3726_vm2, 0, %v710_v22  ;;  %v4009_v34 = vsel %vm3764_vm5, %v800_v39, 0  ;;  %v724_v22 = vor.u32 %v722_v17, %v721_v37  ;;  %v802_v50 = vor.u32 %v801_v40, %v705_v35 }
 0x13e   : > { %v812_v11 = vor.u32 %v811_v6, %v740_v5  ;;  %v2796_v6 = vpop.f32.mrb[2].mxu1  ;;  %v728_v38 = vrot.slane %v726_v12, 7  ;;  %v729_v35 = vshll.u32 %v3906_v26, 16  ;;  %v805_v0 = vrot.slane %v722_v17, 1 }
 0x13f   : > { %v4022_v1 = vsel %vm3726_vm2, 0, %v724_v22  ;;  %v4027_v46 = vsel %vm3764_vm5, %v802_v50, 0  ;;  %v736_v22 = vshll.u32 %v3932_v2, 16 }
 0x140   : > { %v3958_v59 = vsel %vm3764_vm5, %v812_v11, 0  ;;  %v2797_v11 = vpop.f32.mrb[3].mxu1  ;;  %v731_v39 = vor.u32 %v729_v35, %v728_v38  ;;  %v806_v50 = vor.u32 %v805_v0, %v719_v7  ;;  %v807_v38 = vrot.slane %v729_v35, 1 }
 0x141   : > { %v4004_v32 = vadd.f32 %v2797_v11, %v2796_v6  ;;  %v733_v6 = vshrl.u32 %v3932_v2, 16  ;;  %v804_v11 = vor.u32 %v803_v58, %v712_v53  ;;  %v809_v35 = vrot.slane %v736_v22, 1 }
 0x142   : > { %1528 = vmatmul.mubr.bf16.gmra.mrb[32].mxu1 %v3944_v9  ;;  %v4043_v40 = vsel %vm3726_vm2, 0, %v731_v39  ;;  %v4054_v17 = vsel %vm3764_vm5, %v806_v50, 0  ;;  %v808_v7 = vor.u32 %v807_v38, %v726_v12 }
 0x143   : > { %1535 = vmatprep.mubr.bf16.mxu1 %v3854_v21  ;;  %1681 = vmatmul.mubr.bf16.gmra.mrb[60].mxu0 %v3967_v36  ;;  %v735_v33 = vrot.slane %v733_v6, 7  ;;  %v4037_v37 = vsel %vm3764_vm5, %v804_v11, 0  ;;  %v742_v11 = vrot.slane %v740_v5, 7  ;;  %v810_v12 = vor.u32 %v809_v35, %v733_v6 }
 0x144   : > { %1688 = vmatprep.mubr.bf16.mxu0 %v3962_v30 }
 0x145   : > { %v738_v53 = vor.u32 %v736_v22, %v735_v33  ;;  %v745_v39 = vor.u32 %v743_v10, %v742_v11  ;;  %v4066_v33 = vsel %vm3764_vm5, %v808_v7, 0  ;;  %v3443_v10 = vld [vmem:[%s4441_s3 + $0x208] sm:$0xff]   ;;  %v4081_v0 = vsel %vm3764_vm5, %v810_v12, 0 }
 0x147   : > { %v4049_v58 = vsel %vm3726_vm2, 0, %v738_v53  ;;  %v4072_v5 = vsel %vm3726_vm2, 0, %v745_v39 }
 0x14a   : > { %1536 = vmatmul.mubr.bf16.gmra.mrb[36].mxu1 %v3962_v30 }
 0x14b   : > { %1543 = vmatprep.mubr.bf16.mxu1 %v3845_v14  ;;  %1689 = vmatmul.mubr.bf16.gmra.mrb[64].mxu0 %v3977_v41 }
 0x14c   : > { %1696 = vmatprep.mubr.bf16.mxu0 %v3983_v45 }
 0x152   : > { %1544 = vmatmul.mubr.bf16.gmra.mrb[40].mxu1 %v3983_v45 }
 0x153   : > { %1551 = vmatprep.mubr.bf16.mxu1 %v3884_v54  ;;  %1697 = vmatmul.mubr.bf16.gmra.mrb[68].mxu0 %v3995_v61 }
 0x154   : > { %1704 = vmatprep.mubr.bf16.mxu0 %v3990_v55 }
 0x15a   : > { %1552 = vmatmul.mubr.bf16.gmra.mrb[44].mxu1 %v3990_v55 }
 0x15b   : > { %1559 = vmatprep.mubr.bf16.mxu1 %v3880_v29  ;;  %1705 = vmatmul.mubr.bf16.gmra.mrb[72].mxu0 %v4009_v34 }
 0x15c   : > { %1712 = vmatprep.mubr.bf16.mxu0 %v4015_v42 }
 0x162   : > { %1560 = vmatmul.mubr.bf16.gmra.mrb[48].mxu1 %v4015_v42 }
 0x163   : > { %1567 = vmatprep.mubr.bf16.mxu1 %v3912_v28  ;;  %1713 = vmatmul.mubr.bf16.gmra.mrb[76].mxu0 %v4027_v46 }
 0x164   : > { %1720 = vmatprep.mubr.bf16.mxu0 %v4022_v1 }
 0x16a   : > { %1568 = vmatmul.mubr.bf16.gmra.mrb[52].mxu1 %v4022_v1 }
 0x16b   : > { %1575 = vmatprep.mubr.bf16.mxu1 %v3906_v26  ;;  %1721 = vmatmul.mubr.bf16.gmra.mrb[80].mxu0 %v4037_v37 }
 0x16c   : > { %1728 = vmatprep.mubr.bf16.mxu0 %v4043_v40 }
 0x172   : > { %1576 = vmatmul.mubr.bf16.gmra.mrb[56].mxu1 %v4043_v40 }
 0x173   : > { %1583 = vmatprep.mubr.bf16.mxu1 %v3932_v2  ;;  %1729 = vmatmul.mubr.bf16.gmra.mrb[84].mxu0 %v4054_v17 }
 0x174   : > { %1736 = vmatprep.mubr.bf16.mxu0 %v4049_v58 }
 0x17a   : > { %1584 = vmatmul.mubr.bf16.gmra.mrb[60].mxu1 %v4049_v58 }
 0x17b   : > { %1737 = vmatmul.mubr.bf16.gmra.mrb[88].mxu0 %v4066_v33  ;;  %1785 = vmatprep.mubr.bf16.mxu1 %v3786_v20 }
 0x17c   : > { %1744 = vmatprep.mubr.bf16.mxu0 %v4072_v5 }
 0x182   : > { %1786 = vmatmul.mubr.bf16.vlgmr.msra.gmra.mrb[64].mxu1 %v3713_v25  ;;  %v3445_v25 = vld [vmem:[%s4441_s3 + $0x218] sm:$0xff]  }
 0x183   : > { %3298 = vmatpush3.bf16.msra.mxu1 %v3707_v18  ;;  %1745 = vmatmul.mubr.bf16.gmra.mrb[92].mxu0 %v4081_v0  ;;  %v3446_v18 = vld [vmem:[%s4441_s3 + $0x220] sm:$0xff]  }
 0x184   : > { %1793 = vmatprep.mubr.bf16.mxu1 %v3822_v52  ;;  %1946 = vmatprep.mubr.bf16.mxu0 %v3711_v24 }
 0x185   : > { %3299 = vmatprep.subr.bf16.mxu1 %v3443_v10 }
 0x187   : > { %3300 = vmatpush3.bf16.msra.mxu1 %v3443_v10 }
 0x188   : > { %3301 = vmatprep.subr.bf16.mxu1 %v3444_v43 }
 0x18a   : > { %1794 = vmatmul.mubr.bf16.gmra.mrb[68].mxu1 %v3711_v24  ;;  %v3448_v24 = vld [vmem:[%s4441_s3 + $0x230] sm:$0xff]  }
 0x18b   : > { %1801 = vmatprep.mubr.bf16.mxu1 %v3862_v23  ;;  %1947 = vmatmul.mubr.bf16.vlgmr.msra.gmra.mrb[96].mxu0 %v3747_v57  ;;  %v3449_v57 = vld [vmem:[%s4441_s3 + $0x238] sm:$0xff]  }
 0x18c   : > { %1954 = vmatprep.mubr.bf16.mxu0 %v3735_v49  ;;  %3302 = vmatpush3.bf16.msra.mxu1 %v3444_v43 }
 0x18d   : > { %3303 = vmatprep.subr.bf16.mxu1 %v3445_v25 }
 0x190   : > { %3304 = vmatpush3.bf16.msra.mxu1 %v3445_v25 }
 0x191   : > { %3305 = vmatprep.subr.bf16.mxu1 %v3446_v18 }
 0x192   : > { %1802 = vmatmul.mubr.bf16.gmra.mrb[72].mxu1 %v3735_v49 }
 0x193   : > { %1809 = vmatprep.mubr.bf16.mxu1 %v3889_v60  ;;  %1955 = vmatmul.mubr.bf16.gmra.mrb[100].mxu0 %v3776_v15 }
 0x194   : > { %1962 = vmatprep.mubr.bf16.mxu0 %v3730_v47  ;;  %3306 = vmatpush3.bf16.msra.mxu1 %v3446_v18 }
 0x195   : > { %3307 = vmatprep.subr.bf16.mxu1 %v3447_v8 }
 0x198   : > { %3308 = vmatpush3.bf16.msra.mxu1 %v3447_v8 }
 0x199   : > { %3309 = vmatprep.subr.bf16.mxu1 %v3448_v24 }
 0x19a   : > { %1810 = vmatmul.mubr.bf16.gmra.mrb[76].mxu1 %v3730_v47  ;;  %v4152_v47 = vld [vmem:[%s4442_s4] ss:$0 sm:$0xff] }
 0x19b   : > { %1817 = vmatprep.mubr.bf16.mxu1 %v3917_v31  ;;  %1963 = vmatmul.mubr.bf16.gmra.mrb[104].mxu0 %v3829_v56 }
 0x19c   : > { %1970 = vmatprep.mubr.bf16.mxu0 %v3778_v16  ;;  %3310 = vmatpush3.bf16.msra.mxu1 %v3448_v24 }
 0x19d   : > { %3311 = vmatprep.subr.bf16.mxu1 %v3449_v57 }
 0x1a0   : > { %3312 = vmatpush3.bf16.msra.mxu1 %v3449_v57 }
 0x1a2   : > { %1818 = vmatmul.mubr.bf16.gmra.mrb[80].mxu1 %v3778_v16 }
 0x1a3   : > { %1825 = vmatprep.mubr.bf16.mxu1 %v3937_v3  ;;  %1971 = vmatmul.mubr.bf16.gmra.mrb[108].mxu0 %v3852_v19 }
 0x1a4   : > { %1978 = vmatprep.mubr.bf16.mxu0 %v3769_v13 }
 0x1aa   : > { %1826 = vmatmul.mubr.bf16.gmra.mrb[84].mxu1 %v3769_v13 }
 0x1ab   : > { %1833 = vmatprep.mubr.bf16.mxu1 %v3967_v36  ;;  %1979 = vmatmul.mubr.bf16.gmra.mrb[112].mxu0 %v3896_v63 }
 0x1ac   : > { %1986 = vmatprep.mubr.bf16.mxu0 %v3814_v48 }
 0x1b2   : > { %1834 = vmatmul.mubr.bf16.gmra.mrb[88].mxu1 %v3814_v48  ;;  %v1466_v48 = vadd.f32 %v4000_v4, %v4152_v47 }
 0x1b3   : > { %1841 = vmatprep.mubr.bf16.mxu1 %v3977_v41  ;;  %1987 = vmatmul.mubr.bf16.gmra.mrb[116].mxu0 %v3910_v27 }
 0x1b4   : > { %1994 = vmatprep.mubr.bf16.mxu0 %v3807_v44 }
 0x1ba   : > { %1842 = vmatmul.mubr.bf16.gmra.mrb[92].mxu1 %v3807_v44 }
 0x1bb   : > { %1849 = vmatprep.mubr.bf16.mxu1 %v3995_v61  ;;  %1995 = vmatmul.mubr.bf16.gmra.mrb[120].mxu0 %v3944_v9 }
 0x1bc   : > { %2002 = vmatprep.mubr.bf16.mxu0 %v3854_v21 }
 0x1c2   : > { %1850 = vmatmul.mubr.bf16.gmra.mrb[96].mxu1 %v3854_v21 }
 0x1c3   : > { %1857 = vmatprep.mubr.bf16.mxu1 %v4009_v34  ;;  %2003 = vmatmul.mubr.bf16.gmra.mrb[124].mxu0 %v3962_v30 }
 0x1c4   : > { %2010 = vmatprep.mubr.bf16.mxu0 %v3845_v14 }
 0x1ca   : > { %1858 = vmatmul.mubr.bf16.gmra.mrb[100].mxu1 %v3845_v14 }
 0x1cb   : > { %1865 = vmatprep.mubr.bf16.mxu1 %v4027_v46  ;;  %2011 = vmatmul.mubr.bf16.gmra.mrb[128].mxu0 %v3983_v45 }
 0x1cc   : > { %2018 = vmatprep.mubr.bf16.mxu0 %v3884_v54 }
 0x1d2   : > { %1866 = vmatmul.mubr.bf16.gmra.mrb[104].mxu1 %v3884_v54  ;;  %v1469_v54 = vadd.f32 %v4004_v32, %v4152_v47 }
 0x1d3   : > { %1873 = vmatprep.mubr.bf16.mxu1 %v4037_v37  ;;  %2019 = vmatmul.mubr.bf16.gmra.mrb[132].mxu0 %v3990_v55 }
 0x1d4   : > { %2026 = vmatprep.mubr.bf16.mxu0 %v3880_v29 }
 0x1da   : > { %1874 = vmatmul.mubr.bf16.gmra.mrb[108].mxu1 %v3880_v29 }
 0x1db   : > { %1881 = vmatprep.mubr.bf16.mxu1 %v4054_v17  ;;  %2027 = vmatmul.mubr.bf16.gmra.mrb[136].mxu0 %v4015_v42 }
 0x1dc   : > { %2034 = vmatprep.mubr.bf16.mxu0 %v3912_v28 }
 0x1dd   : > { %v2799_v49 = vpop.f32.mrb[4].mxu1 }
 0x1de   : > { %v2800_v13 = vpop.f32.mrb[5].mxu1  ;;  %v2905_v15 = vpop.f32.mrb[32].mxu0 }
 0x1df   : > { %v2801_v16 = vadd.f32 %v2800_v13, %v2799_v49  ;;  %v2802_v20 = vpop.f32.mrb[6].mxu1  ;;  %v2906_v44 = vpop.f32.mrb[33].mxu0 }
 0x1e0   : > { %v2907_v56 = vadd.f32 %v2906_v44, %v2905_v15  ;;  %v2803_v14 = vpop.f32.mrb[7].mxu1  ;;  %v2908_v19 = vpop.f32.mrb[34].mxu0 }
 0x1e1   : > { %v2804_v21 = vadd.f32 %v2803_v14, %v2802_v20  ;;  %v2909_v29 = vpop.f32.mrb[35].mxu0  ;;  %v1474_v32 = vadd.f32 %v2801_v16, %v4152_v47 }
 0x1e2   : > { %v4158_v63 = vadd.f32 %v2907_v56, %v1466_v48  ;;  %v2910_v27 = vadd.f32 %v2909_v29, %v2908_v19  ;;  %1882 = vmatmul.mubr.bf16.gmra.mrb[112].mxu1 %v3912_v28 }
 0x1e3   : > { %1889 = vmatprep.mubr.bf16.mxu1 %v4066_v33  ;;  %2035 = vmatmul.mubr.bf16.gmra.mrb[140].mxu0 %v4022_v1  ;;  %v1477_v11 = vadd.f32 %v2804_v21, %v4152_v47 }
 0x1e4   : > { %v4163_v9 = vadd.f32 %v2910_v27, %v1469_v54  ;;  %2042 = vmatprep.mubr.bf16.mxu0 %v3906_v26 }
 0x1e5   : > { %v2805_v30 = vpop.f32.mrb[8].mxu1 }
 0x1e6   : > { %v2806_v45 = vpop.f32.mrb[9].mxu1  ;;  %v2911_v55 = vpop.f32.mrb[36].mxu0 }
 0x1e7   : > { %v2807_v4 = vadd.f32 %v2806_v45, %v2805_v30  ;;  %v2808_v42 = vpop.f32.mrb[10].mxu1  ;;  %v2912_v6 = vpop.f32.mrb[37].mxu0 }
 0x1e8   : > { %v2913_v22 = vadd.f32 %v2912_v6, %v2911_v55  ;;  %v2809_v53 = vpop.f32.mrb[11].mxu1  ;;  %v2914_v50 = vpop.f32.mrb[38].mxu0 }
 0x1e9   : > { %v2810_v28 = vadd.f32 %v2809_v53, %v2808_v42  ;;  %v2915_v38 = vpop.f32.mrb[39].mxu0  ;;  %v1482_v8 = vadd.f32 %v2807_v4, %v4152_v47 }
 0x1ea   : > { %v4168_v1 = vadd.f32 %v2913_v22, %v1474_v32  ;;  %v2916_v7 = vadd.f32 %v2915_v38, %v2914_v50  ;;  %1890 = vmatmul.mubr.bf16.gmra.mrb[116].mxu1 %v3906_v26 }
 0x1eb   : > { %1897 = vmatprep.mubr.bf16.mxu1 %v4081_v0  ;;  %2043 = vmatmul.mubr.bf16.gmra.mrb[144].mxu0 %v4043_v40  ;;  %v1485_v15 = vadd.f32 %v2810_v28, %v4152_v47 }
 0x1ec   : > { %v4173_v39 = vadd.f32 %v2916_v7, %v1477_v11  ;;  %2050 = vmatprep.mubr.bf16.mxu0 %v3932_v2 }
 0x1ed   : > { %v2811_v35 = vpop.f32.mrb[12].mxu1 }
 0x1ee   : > { %v2812_v12 = vpop.f32.mrb[13].mxu1  ;;  %v2917_v10 = vpop.f32.mrb[40].mxu0 }
 0x1ef   : > { %v2813_v43 = vadd.f32 %v2812_v12, %v2811_v35  ;;  %v2814_v25 = vpop.f32.mrb[14].mxu1  ;;  %v2918_v18 = vpop.f32.mrb[41].mxu0 }
 0x1f0   : > { %v2919_v24 = vadd.f32 %v2918_v18, %v2917_v10  ;;  %v2815_v57 = vpop.f32.mrb[15].mxu1  ;;  %v2920_v49 = vpop.f32.mrb[42].mxu0 }
 0x1f1   : > { %v2816_v26 = vadd.f32 %v2815_v57, %v2814_v25  ;;  %v2921_v13 = vpop.f32.mrb[43].mxu0  ;;  %v1490_v29 = vadd.f32 %v2813_v43, %v4152_v47 }
 0x1f2   : > { %v4178_v40 = vadd.f32 %v2919_v24, %v1482_v8  ;;  %v2922_v16 = vadd.f32 %v2921_v13, %v2920_v49  ;;  %1898 = vmatmul.mubr.bf16.gmra.mrb[120].mxu1 %v3932_v2 }
 0x1f3   : > { %1905 = vmatprep.mubr.bf16.mxu1 %v3958_v59  ;;  %2051 = vmatmul.mubr.bf16.gmra.mrb[148].mxu0 %v4049_v58  ;;  %v1493_v55 = vadd.f32 %v2816_v26, %v4152_v47 }
 0x1f4   : > { %v4183_v20 = vadd.f32 %v2922_v16, %v1485_v15  ;;  %2058 = vmatprep.mubr.bf16.mxu0 %v3930_v62 }
 0x1f5   : > { %v2817_v44 = vpop.f32.mrb[16].mxu1 }
 0x1f6   : > { %v2818_v48 = vpop.f32.mrb[17].mxu1  ;;  %v2923_v56 = vpop.f32.mrb[44].mxu0 }
 0x1f7   : > { %v2819_v14 = vadd.f32 %v2818_v48, %v2817_v44  ;;  %v2820_v19 = vpop.f32.mrb[18].mxu1  ;;  %v2924_v21 = vpop.f32.mrb[45].mxu0 }
 0x1f8   : > { %v2925_v54 = vadd.f32 %v2924_v21, %v2923_v56  ;;  %v2821_v27 = vpop.f32.mrb[19].mxu1  ;;  %v2926_v30 = vpop.f32.mrb[46].mxu0 }
 0x1f9   : > { %v2822_v2 = vadd.f32 %v2821_v27, %v2820_v19  ;;  %v2927_v45 = vpop.f32.mrb[47].mxu0  ;;  %v1498_v38 = vadd.f32 %v2819_v14, %v4152_v47 }
 0x1fa   : > { %v4188_v58 = vadd.f32 %v2925_v54, %v1490_v29  ;;  %v2928_v4 = vadd.f32 %v2927_v45, %v2926_v30  ;;  %1906 = vmatmul.mubr.bf16.gmra.mrb[124].mxu1 %v3930_v62 }
 0x1fb   : > { %2059 = vmatmul.mubr.bf16.gmra.mrb[152].mxu0 %v4072_v5  ;;  %3313 = vmatprep.mubr.bf16.mxu1 %v3822_v52  ;;  %v1501_v5 = vadd.f32 %v2822_v2, %v4152_v47 }
 0x1fc   : > { %v4193_v42 = vadd.f32 %v2928_v4, %v1493_v55  ;;  %2066 = vmatprep.mubr.bf16.mxu0 %v3458_v51 }
 0x1fd   : > { %v2823_v6 = vpop.f32.mrb[20].mxu1 }
 0x1fe   : > { %v2824_v32 = vpop.f32.mrb[21].mxu1  ;;  %v2929_v22 = vpop.f32.mrb[48].mxu0 }
 0x1ff   : > { %v2825_v53 = vadd.f32 %v2824_v32, %v2823_v6  ;;  %v2826_v50 = vpop.f32.mrb[22].mxu1  ;;  %v2930_v28 = vpop.f32.mrb[49].mxu0 }
 0x200   : > { %v2931_v11 = vadd.f32 %v2930_v28, %v2929_v22  ;;  %v2827_v7 = vpop.f32.mrb[23].mxu1  ;;  %v2932_v35 = vpop.f32.mrb[50].mxu0 }
 0x201   : > { %v2828_v62 = vadd.f32 %v2827_v7, %v2826_v50  ;;  %v2933_v12 = vpop.f32.mrb[51].mxu0  ;;  %v1506_v26 = vadd.f32 %v2825_v53, %v4152_v47 }
 0x202   : > { %v4198_v52 = vadd.f32 %v2931_v11, %v1498_v38  ;;  %v2934_v10 = vadd.f32 %v2933_v12, %v2932_v35  ;;  %3314 = vmatmul.mubr.bf16.vlgmr.msra.gmra.mrb[128].mxu1 %v3862_v23 }
 0x203   : > { %2067 = vmatmul.mubr.bf16.gmra.mrb[156].mxu0 %v3458_v51  ;;  %3317 = vmatprep.mubr.bf16.mxu1 %v3889_v60  ;;  %v1509_v23 = vadd.f32 %v2828_v62, %v4152_v47 }
 0x204   : > { %v4203_v43 = vadd.f32 %v2934_v10, %v1501_v5 }
 0x205   : > { %v2829_v25 = vpop.f32.mrb[24].mxu1 }
 0x206   : > { %v2830_v18 = vpop.f32.mrb[25].mxu1  ;;  %v2935_v8 = vpop.f32.mrb[52].mxu0 }
 0x207   : > { %v2831_v24 = vadd.f32 %v2830_v18, %v2829_v25  ;;  %v2832_v57 = vpop.f32.mrb[26].mxu1  ;;  %v2936_v49 = vpop.f32.mrb[53].mxu0 }
 0x208   : > { %v2937_v13 = vadd.f32 %v2936_v49, %v2935_v8  ;;  %v2833_v15 = vpop.f32.mrb[27].mxu1  ;;  %v2938_v16 = vpop.f32.mrb[54].mxu0 }
 0x209   : > { %v2834_v44 = vadd.f32 %v2833_v15, %v2832_v57  ;;  %v2939_v48 = vpop.f32.mrb[55].mxu0  ;;  %v1514_v2 = vadd.f32 %v2831_v24, %v4152_v47 }
 0x20a   : > { %v4207_v56 = vadd.f32 %v2937_v13, %v1506_v26  ;;  %v2940_v60 = vadd.f32 %v2939_v48, %v2938_v16  ;;  %3318 = vmatmul.mubr.bf16.gmra.mrb[132].mxu1 %v3917_v31 }
 0x20b   : > { %3321 = vmatprep.mubr.bf16.mxu1 %v3937_v3  ;;  %v1517_v22 = vadd.f32 %v2834_v44, %v4152_v47 }
 0x20c   : > { %v4211_v14 = vadd.f32 %v2940_v60, %v1509_v23 }
 0x20d   : > { %v2835_v19 = vpop.f32.mrb[28].mxu1 }
 0x20e   : > { %v2836_v21 = vpop.f32.mrb[29].mxu1  ;;  %v2941_v29 = vpop.f32.mrb[56].mxu0 }
 0x20f   : > { %v2837_v54 = vadd.f32 %v2836_v21, %v2835_v19  ;;  %v2838_v27 = vpop.f32.mrb[30].mxu1  ;;  %v2942_v30 = vpop.f32.mrb[57].mxu0 }
 0x210   : > { %v2943_v45 = vadd.f32 %v2942_v30, %v2941_v29  ;;  %v2839_v55 = vpop.f32.mrb[31].mxu1  ;;  %v2944_v4 = vpop.f32.mrb[58].mxu0 }
 0x211   : > { %v2840_v6 = vadd.f32 %v2839_v55, %v2838_v27  ;;  %v2945_v32 = vpop.f32.mrb[59].mxu0  ;;  %v1522_v62 = vadd.f32 %v2837_v54, %v4152_v47 }
 0x212   : > { %v4215_v31 = vadd.f32 %v2943_v45, %v1514_v2  ;;  %v2946_v3 = vadd.f32 %v2945_v32, %v2944_v4  ;;  %3322 = vmatmul.mubr.bf16.gmra.mrb[136].mxu1 %v3967_v36 }
 0x213   : > { %3325 = vmatprep.mubr.bf16.mxu1 %v3977_v41  ;;  %v1525_v8 = vadd.f32 %v2840_v6, %v4152_v47 }
 0x214   : > { %v4219_v53 = vadd.f32 %v2946_v3, %v1517_v22 }
 0x215   : > { %v2841_v50 = vpop.f32.mrb[32].mxu1 }
 0x216   : > { %v2842_v28 = vpop.f32.mrb[33].mxu1  ;;  %v2947_v38 = vpop.f32.mrb[60].mxu0 }
 0x217   : > { %v2843_v11 = vadd.f32 %v2842_v28, %v2841_v50  ;;  %v2844_v7 = vpop.f32.mrb[34].mxu1  ;;  %v2948_v35 = vpop.f32.mrb[61].mxu0 }
 0x218   : > { %v2949_v12 = vadd.f32 %v2948_v35, %v2947_v38  ;;  %v2845_v5 = vpop.f32.mrb[35].mxu1  ;;  %v2950_v10 = vpop.f32.mrb[62].mxu0 }
 0x219   : > { %v2846_v25 = vadd.f32 %v2845_v5, %v2844_v7  ;;  %v2951_v18 = vpop.f32.mrb[63].mxu0  ;;  %v1530_v44 = vadd.f32 %v2843_v11, %v4152_v47 }
 0x21a   : > { %v4223_v36 = vadd.f32 %v2949_v12, %v1522_v62  ;;  %v2952_v41 = vadd.f32 %v2951_v18, %v2950_v10  ;;  %3326 = vmatmul.mubr.bf16.gmra.mrb[140].mxu1 %v3995_v61 }
 0x21b   : > { %3329 = vmatprep.mubr.bf16.mxu1 %v4009_v34  ;;  %v1533_v29 = vadd.f32 %v2846_v25, %v4152_v47 }
 0x21c   : > { %v4227_v24 = vadd.f32 %v2952_v41, %v1525_v8 }
 0x21d   : > { %v2847_v57 = vpop.f32.mrb[36].mxu1 }
 0x21e   : > { %v2848_v49 = vpop.f32.mrb[37].mxu1  ;;  %v2953_v26 = vpop.f32.mrb[64].mxu0 }
 0x21f   : > { %v2849_v13 = vadd.f32 %v2848_v49, %v2847_v57  ;;  %v2850_v15 = vpop.f32.mrb[38].mxu1  ;;  %v2954_v16 = vpop.f32.mrb[65].mxu0 }
 0x220   : > { %v2955_v48 = vadd.f32 %v2954_v16, %v2953_v26  ;;  %v2851_v23 = vpop.f32.mrb[39].mxu1  ;;  %v2956_v60 = vpop.f32.mrb[66].mxu0 }
 0x221   : > { %v2852_v19 = vadd.f32 %v2851_v23, %v2850_v15  ;;  %v2957_v21 = vpop.f32.mrb[67].mxu0  ;;  %v1538_v6 = vadd.f32 %v2849_v13, %v4152_v47 }
 0x222   : > { %v4231_v61 = vadd.f32 %v2955_v48, %v1530_v44  ;;  %v2958_v34 = vadd.f32 %v2957_v21, %v2956_v60  ;;  %3330 = vmatmul.mubr.bf16.gmra.mrb[144].mxu1 %v4027_v46 }
 0x223   : > { %3333 = vmatprep.mubr.bf16.mxu1 %v4037_v37  ;;  %v1541_v38 = vadd.f32 %v2852_v19, %v4152_v47 }
 0x224   : > { %v4235_v54 = vadd.f32 %v2958_v34, %v1533_v29 }
 0x225   : > { %v2853_v27 = vpop.f32.mrb[40].mxu1 }
 0x226   : > { %v2854_v30 = vpop.f32.mrb[41].mxu1  ;;  %v2959_v2 = vpop.f32.mrb[68].mxu0 }
 0x227   : > { %v2855_v45 = vadd.f32 %v2854_v30, %v2853_v27  ;;  %v2856_v55 = vpop.f32.mrb[42].mxu1  ;;  %v2960_v4 = vpop.f32.mrb[69].mxu0 }
 0x228   : > { %v2961_v32 = vadd.f32 %v2960_v4, %v2959_v2  ;;  %v2857_v22 = vpop.f32.mrb[43].mxu1  ;;  %v2962_v3 = vpop.f32.mrb[70].mxu0 }
 0x229   : > { %v2858_v50 = vadd.f32 %v2857_v22, %v2856_v55  ;;  %v2963_v28 = vpop.f32.mrb[71].mxu0  ;;  %v1546_v25 = vadd.f32 %v2855_v45, %v4152_v47 }
 0x22a   : > { %v4239_v46 = vadd.f32 %v2961_v32, %v1538_v6  ;;  %v2964_v37 = vadd.f32 %v2963_v28, %v2962_v3  ;;  %3334 = vmatmul.mubr.bf16.gmra.mrb[148].mxu1 %v4054_v17 }
 0x22b   : > { %3337 = vmatprep.mubr.bf16.mxu1 %v4066_v33  ;;  %v1549_v26 = vadd.f32 %v2858_v50, %v4152_v47 }
 0x22c   : > { %v4243_v11 = vadd.f32 %v2964_v37, %v1541_v38 }
 0x22d   : > { %v2859_v7 = vpop.f32.mrb[44].mxu1 }
 0x22e   : > { %v2860_v35 = vpop.f32.mrb[45].mxu1  ;;  %v2965_v62 = vpop.f32.mrb[72].mxu0 }
 0x22f   : > { %v2861_v12 = vadd.f32 %v2860_v35, %v2859_v7  ;;  %v2862_v5 = vpop.f32.mrb[46].mxu1  ;;  %v2966_v10 = vpop.f32.mrb[73].mxu0 }
 0x230   : > { %v2967_v18 = vadd.f32 %v2966_v10, %v2965_v62  ;;  %v2863_v8 = vpop.f32.mrb[47].mxu1  ;;  %v2968_v41 = vpop.f32.mrb[74].mxu0 }
 0x231   : > { %v2864_v57 = vadd.f32 %v2863_v8, %v2862_v5  ;;  %v2969_v49 = vpop.f32.mrb[75].mxu0  ;;  %v1554_v19 = vadd.f32 %v2861_v12, %v4152_v47 }
 0x232   : > { %v4247_v17 = vadd.f32 %v2967_v18, %v1546_v25  ;;  %v2970_v33 = vadd.f32 %v2969_v49, %v2968_v41  ;;  %3338 = vmatmul.mubr.bf16.gmra.mrb[152].mxu1 %v4081_v0 }
 0x233   : > { %3341 = vmatprep.mubr.bf16.mxu1 %v3958_v59  ;;  %v1557_v2 = vadd.f32 %v2864_v57, %v4152_v47 }
 0x234   : > { %v4251_v13 = vadd.f32 %v2970_v33, %v1549_v26 }
 0x235   : > { %v2865_v15 = vpop.f32.mrb[48].mxu1 }
 0x236   : > { %v2866_v16 = vpop.f32.mrb[49].mxu1  ;;  %v2971_v44 = vpop.f32.mrb[76].mxu0 }
 0x237   : > { %v2867_v48 = vadd.f32 %v2866_v16, %v2865_v15  ;;  %v2868_v23 = vpop.f32.mrb[50].mxu1  ;;  %v2972_v60 = vpop.f32.mrb[77].mxu0 }
 0x238   : > { %v2973_v21 = vadd.f32 %v2972_v60, %v2971_v44  ;;  %v2869_v29 = vpop.f32.mrb[51].mxu1  ;;  %v2974_v34 = vpop.f32.mrb[78].mxu0 }
 0x239   : > { %v2870_v27 = vadd.f32 %v2869_v29, %v2868_v23  ;;  %v2975_v30 = vpop.f32.mrb[79].mxu0  ;;  %v1562_v50 = vadd.f32 %v2867_v48, %v4152_v47 }
 0x23a   : > { %v4255_v0 = vadd.f32 %v2973_v21, %v1554_v19  ;;  %v2976_v59 = vadd.f32 %v2975_v30, %v2974_v34  ;;  %3342 = vmatmul.mubr.bf16.gmra.mrb[156].mxu1 %v3458_v51 }
 0x23b   : > { %v1565_v62 = vadd.f32 %v2870_v27, %v4152_v47 }
 0x23c   : > { %v4258_v45 = vadd.f32 %v2976_v59, %v1557_v2 }
 0x23d   : > { %v2871_v55 = vpop.f32.mrb[52].mxu1 }
 0x23e   : > { %v2872_v4 = vpop.f32.mrb[53].mxu1  ;;  %v2977_v6 = vpop.f32.mrb[80].mxu0 }
 0x23f   : > { %v2873_v32 = vadd.f32 %v2872_v4, %v2871_v55  ;;  %v2874_v22 = vpop.f32.mrb[54].mxu1  ;;  %v2978_v3 = vpop.f32.mrb[81].mxu0 }
 0x240   : > { %v2979_v28 = vadd.f32 %v2978_v3, %v2977_v6  ;;  %v2875_v38 = vpop.f32.mrb[55].mxu1  ;;  %v2980_v37 = vpop.f32.mrb[82].mxu0 }
 0x241   : > { %v2876_v7 = vadd.f32 %v2875_v38, %v2874_v22  ;;  %v2981_v35 = vpop.f32.mrb[83].mxu0  ;;  %v1570_v49 = vadd.f32 %v2873_v32, %v4152_v47 }
 0x242   : > { %v4262_v12 = vadd.f32 %v2979_v28, %v1562_v50  ;;  %v2982_v51 = vadd.f32 %v2981_v35, %v2980_v37 }
 0x243   : > { %v1573_v48 = vadd.f32 %v2876_v7, %v4152_v47 }
 0x244   : > { %v4264_v5 = vadd.f32 %v2982_v51, %v1565_v62 }
 0x245   : > { %v2877_v10 = vpop.f32.mrb[56].mxu1 }
 0x246   : > { %v2878_v25 = vpop.f32.mrb[57].mxu1  ;;  %v2983_v18 = vpop.f32.mrb[84].mxu0 }
 0x247   : > { %v2879_v8 = vadd.f32 %v2878_v25, %v2877_v10  ;;  %v2880_v41 = vpop.f32.mrb[58].mxu1  ;;  %v2984_v57 = vpop.f32.mrb[85].mxu0 }
 0x248   : > { %v2985_v26 = vadd.f32 %v2984_v57, %v2983_v18  ;;  %v2881_v33 = vpop.f32.mrb[59].mxu1  ;;  %v2986_v15 = vpop.f32.mrb[86].mxu0 }
 0x249   : > { %v2882_v16 = vadd.f32 %v2881_v33, %v2880_v41  ;;  %v2987_v44 = vpop.f32.mrb[87].mxu0  ;;  %v1578_v59 = vadd.f32 %v2879_v8, %v4152_v47 }
 0x24a   : > { %v4268_v23 = vadd.f32 %v2985_v26, %v1570_v49  ;;  %v2988_v60 = vadd.f32 %v2987_v44, %v2986_v15 }
 0x24b   : > { %v1581_v3 = vadd.f32 %v2882_v16, %v4152_v47 }
 0x24c   : > { %v4270_v19 = vadd.f32 %v2988_v60, %v1573_v48 }
 0x24d   : > { %v2883_v21 = vpop.f32.mrb[60].mxu1 }
 0x24e   : > { %v2884_v29 = vpop.f32.mrb[61].mxu1  ;;  %v2989_v34 = vpop.f32.mrb[88].mxu0 }
 0x24f   : > { %v2885_v27 = vadd.f32 %v2884_v29, %v2883_v21  ;;  %v2886_v30 = vpop.f32.mrb[62].mxu1  ;;  %v2990_v2 = vpop.f32.mrb[89].mxu0 }
 0x250   : > { %v2991_v55 = vadd.f32 %v2990_v2, %v2989_v34  ;;  %v2887_v4 = vpop.f32.mrb[63].mxu1  ;;  %v2992_v6 = vpop.f32.mrb[90].mxu0 }
 0x251   : > { %v2888_v32 = vadd.f32 %v2887_v4, %v2886_v30  ;;  %v2993_v22 = vpop.f32.mrb[91].mxu0  ;;  %v1586_v25 = vadd.f32 %v2885_v27, %v4152_v47 }
 0x252   : > { %v4274_v50 = vadd.f32 %v2991_v55, %v1578_v59  ;;  %v2994_v28 = vadd.f32 %v2993_v22, %v2992_v6 }
 0x253   : > { %v1589_v33 = vadd.f32 %v2888_v32, %v4152_v47 }
 0x254   : > { %v4276_v38 = vadd.f32 %v2994_v28, %v1581_v3 }
 0x255   : > { %v3017_v37 = vpop.f32.mrb[64].mxu1 }
 0x256   : > { %v2995_v7 = vpop.f32.mrb[92].mxu0  ;;  %v3018_v35 = vpop.f32.mrb[65].mxu1 }
 0x257   : > { %v3019_v62 = vadd.f32 %v3018_v35, %v3017_v37  ;;  %v2996_v51 = vpop.f32.mrb[93].mxu0  ;;  %v3020_v10 = vpop.f32.mrb[66].mxu1 }
 0x258   : > { %v2997_v18 = vadd.f32 %v2996_v51, %v2995_v7  ;;  %v2998_v8 = vpop.f32.mrb[94].mxu0  ;;  %v3021_v41 = vpop.f32.mrb[67].mxu1 }
 0x259   : > { %v1788_v57 = vadd.f32 %v3019_v62, %v4158_v63  ;;  %v3022_v49 = vadd.f32 %v3021_v41, %v3020_v10  ;;  %v2999_v26 = vpop.f32.mrb[95].mxu0 }
 0x25a   : > { %v4281_v15 = vadd.f32 %v2997_v18, %v1586_v25  ;;  %v3000_v16 = vadd.f32 %v2999_v26, %v2998_v8 }
 0x25b   : > { %v1791_v44 = vadd.f32 %v3022_v49, %v4163_v9 }
 0x25c   : > { %v4284_v48 = vadd.f32 %v3000_v16, %v1589_v33 }
 0x25d   : > { %v3023_v60 = vpop.f32.mrb[68].mxu1 }
 0x25e   : > { %v3024_v21 = vpop.f32.mrb[69].mxu1  ;;  %v3129_v29 = vpop.f32.mrb[96].mxu0 }
 0x25f   : > { %v3025_v34 = vadd.f32 %v3024_v21, %v3023_v60  ;;  %v3026_v27 = vpop.f32.mrb[70].mxu1  ;;  %v3130_v30 = vpop.f32.mrb[97].mxu0 }
 0x260   : > { %v3131_v2 = vadd.f32 %v3130_v30, %v3129_v29  ;;  %v3027_v59 = vpop.f32.mrb[71].mxu1  ;;  %v3132_v63 = vpop.f32.mrb[98].mxu0 }
 0x261   : > { %v1796_v55 = vadd.f32 %v3025_v34, %v4168_v1  ;;  %v3028_v4 = vadd.f32 %v3027_v59, %v3026_v27  ;;  %v3133_v47 = vpop.f32.mrb[99].mxu0 }
 0x262   : > { %v3134_v6 = vadd.f32 %v3133_v47, %v3132_v63  ;;  %v4287_v32 = vadd.f32 %v3131_v2, %v1788_v57 }
 0x263   : > { %v1799_v9 = vadd.f32 %v3028_v4, %v4173_v39 }
 0x264   : > { %v4290_v22 = vadd.f32 %v3134_v6, %v1791_v44 }
 0x265   : > { %v3029_v3 = vpop.f32.mrb[72].mxu1 }
 0x266   : > { %v3030_v28 = vpop.f32.mrb[73].mxu1  ;;  %v3135_v37 = vpop.f32.mrb[100].mxu0 }
 0x267   : > { %v3031_v7 = vadd.f32 %v3030_v28, %v3029_v3  ;;  %v3032_v35 = vpop.f32.mrb[74].mxu1  ;;  %v3136_v62 = vpop.f32.mrb[101].mxu0 }
 0x268   : > { %v3137_v51 = vadd.f32 %v3136_v62, %v3135_v37  ;;  %v3033_v10 = vpop.f32.mrb[75].mxu1  ;;  %v3138_v25 = vpop.f32.mrb[102].mxu0 }
 0x269   : > { %v1804_v1 = vadd.f32 %v3031_v7, %v4178_v40  ;;  %v3034_v18 = vadd.f32 %v3033_v10, %v3032_v35  ;;  %v3139_v8 = vpop.f32.mrb[103].mxu0 }
 0x26a   : > { %v3140_v41 = vadd.f32 %v3139_v8, %v3138_v25  ;;  %v4293_v57 = vadd.f32 %v3137_v51, %v1796_v55 }
 0x26b   : > { %v1807_v39 = vadd.f32 %v3034_v18, %v4183_v20 }
 0x26c   : > { %v4296_v49 = vadd.f32 %v3140_v41, %v1799_v9 }
 0x26d   : > { %v3035_v26 = vpop.f32.mrb[76].mxu1 }
 0x26e   : > { %v3036_v33 = vpop.f32.mrb[77].mxu1  ;;  %v3141_v16 = vpop.f32.mrb[104].mxu0 }
 0x26f   : > { %v3037_v44 = vadd.f32 %v3036_v33, %v3035_v26  ;;  %v3038_v60 = vpop.f32.mrb[78].mxu1  ;;  %v3142_v21 = vpop.f32.mrb[105].mxu0 }
 0x270   : > { %v3143_v29 = vadd.f32 %v3142_v21, %v3141_v16  ;;  %v3039_v34 = vpop.f32.mrb[79].mxu1  ;;  %v3144_v27 = vpop.f32.mrb[106].mxu0 }
 0x271   : > { %v1812_v40 = vadd.f32 %v3037_v44, %v4188_v58  ;;  %v3040_v30 = vadd.f32 %v3039_v34, %v3038_v60  ;;  %v3145_v2 = vpop.f32.mrb[107].mxu0 }
 0x272   : > { %v3146_v59 = vadd.f32 %v3145_v2, %v3144_v27  ;;  %v4299_v63 = vadd.f32 %v3143_v29, %v1804_v1 }
 0x273   : > { %v1815_v20 = vadd.f32 %v3040_v30, %v4193_v42 }
 0x274   : > { %v4302_v55 = vadd.f32 %v3146_v59, %v1807_v39 }
 0x275   : > { %v3041_v4 = vpop.f32.mrb[80].mxu1 }
 0x276   : > { %v3042_v47 = vpop.f32.mrb[81].mxu1  ;;  %v3147_v6 = vpop.f32.mrb[108].mxu0 }
 0x277   : > { %v3043_v9 = vadd.f32 %v3042_v47, %v3041_v4  ;;  %v3044_v3 = vpop.f32.mrb[82].mxu1  ;;  %v3148_v28 = vpop.f32.mrb[109].mxu0 }
 0x278   : > { %v3149_v37 = vadd.f32 %v3148_v28, %v3147_v6  ;;  %v3045_v7 = vpop.f32.mrb[83].mxu1  ;;  %v3150_v35 = vpop.f32.mrb[110].mxu0 }
 0x279   : > { %v1820_v58 = vadd.f32 %v3043_v9, %v4198_v52  ;;  %v3046_v62 = vadd.f32 %v3045_v7, %v3044_v3  ;;  %v3151_v51 = vpop.f32.mrb[111].mxu0 }
 0x27a   : > { %v3152_v10 = vadd.f32 %v3151_v51, %v3150_v35  ;;  %v4305_v25 = vadd.f32 %v3149_v37, %v1812_v40 }
 0x27b   : > { %v1823_v42 = vadd.f32 %v3046_v62, %v4203_v43 }
 0x27c   : > { %v4308_v1 = vadd.f32 %v3152_v10, %v1815_v20 }
 0x27d   : > { %v3047_v18 = vpop.f32.mrb[84].mxu1 }
 0x27e   : > { %v3048_v8 = vpop.f32.mrb[85].mxu1  ;;  %v3153_v41 = vpop.f32.mrb[112].mxu0 }
 0x27f   : > { %v3049_v39 = vadd.f32 %v3048_v8, %v3047_v18  ;;  %v3050_v26 = vpop.f32.mrb[86].mxu1  ;;  %v3154_v33 = vpop.f32.mrb[113].mxu0 }
 0x280   : > { %v3155_v16 = vadd.f32 %v3154_v33, %v3153_v41  ;;  %v3051_v44 = vpop.f32.mrb[87].mxu1  ;;  %v3156_v60 = vpop.f32.mrb[114].mxu0 }
 0x281   : > { %v1828_v52 = vadd.f32 %v3049_v39, %v4207_v56  ;;  %v3052_v21 = vadd.f32 %v3051_v44, %v3050_v26  ;;  %v3157_v29 = vpop.f32.mrb[115].mxu0 }
 0x282   : > { %v3158_v34 = vadd.f32 %v3157_v29, %v3156_v60  ;;  %v4311_v27 = vadd.f32 %v3155_v16, %v1820_v58 }
 0x283   : > { %v1831_v43 = vadd.f32 %v3052_v21, %v4211_v14 }
 0x284   : > { %v4314_v40 = vadd.f32 %v3158_v34, %v1823_v42 }
 0x285   : > { %v3053_v30 = vpop.f32.mrb[88].mxu1 }
 0x286   : > { %v3054_v2 = vpop.f32.mrb[89].mxu1  ;;  %v3159_v59 = vpop.f32.mrb[116].mxu0 }
 0x287   : > { %v3055_v20 = vadd.f32 %v3054_v2, %v3053_v30  ;;  %v3056_v4 = vpop.f32.mrb[90].mxu1  ;;  %v3160_v47 = vpop.f32.mrb[117].mxu0 }
 0x288   : > { %v3161_v6 = vadd.f32 %v3160_v47, %v3159_v59  ;;  %v3057_v9 = vpop.f32.mrb[91].mxu1  ;;  %v3162_v3 = vpop.f32.mrb[118].mxu0 }
 0x289   : > { %v1836_v56 = vadd.f32 %v3055_v20, %v4215_v31  ;;  %v3058_v28 = vadd.f32 %v3057_v9, %v3056_v4  ;;  %v3163_v37 = vpop.f32.mrb[119].mxu0 }
 0x28a   : > { %v3164_v7 = vadd.f32 %v3163_v37, %v3162_v3  ;;  %v4317_v35 = vadd.f32 %v3161_v6, %v1828_v52 }
 0x28b   : > { %v1839_v14 = vadd.f32 %v3058_v28, %v4219_v53 }
 0x28c   : > { %v4320_v58 = vadd.f32 %v3164_v7, %v1831_v43 }
 0x28d   : > { %v3059_v62 = vpop.f32.mrb[92].mxu1 }
 0x28e   : > { %v3060_v51 = vpop.f32.mrb[93].mxu1  ;;  %v3165_v10 = vpop.f32.mrb[120].mxu0 }
 0x28f   : > { %v3061_v42 = vadd.f32 %v3060_v51, %v3059_v62  ;;  %v3062_v18 = vpop.f32.mrb[94].mxu1  ;;  %v3166_v8 = vpop.f32.mrb[121].mxu0 }
 0x290   : > { %v3167_v41 = vadd.f32 %v3166_v8, %v3165_v10  ;;  %v3063_v39 = vpop.f32.mrb[95].mxu1  ;;  %v3168_v26 = vpop.f32.mrb[122].mxu0 }
 0x291   : > { %v1844_v31 = vadd.f32 %v3061_v42, %v4223_v36  ;;  %v3064_v33 = vadd.f32 %v3063_v39, %v3062_v18  ;;  %v3169_v16 = vpop.f32.mrb[123].mxu0 }
 0x292   : > { %v3170_v44 = vadd.f32 %v3169_v16, %v3168_v26  ;;  %v4323_v60 = vadd.f32 %v3167_v41, %v1836_v56 }
 0x293   : > { %v1847_v53 = vadd.f32 %v3064_v33, %v4227_v24 }
 0x294   : > { %v4326_v52 = vadd.f32 %v3170_v44, %v1839_v14 }
 0x295   : > { %v3065_v21 = vpop.f32.mrb[96].mxu1 }
 0x296   : > { %v3066_v29 = vpop.f32.mrb[97].mxu1  ;;  %v3171_v34 = vpop.f32.mrb[124].mxu0 }
 0x297   : > { %v3067_v43 = vadd.f32 %v3066_v29, %v3065_v21  ;;  %v3068_v30 = vpop.f32.mrb[98].mxu1  ;;  %v3172_v2 = vpop.f32.mrb[125].mxu0 }
 0x298   : > { %v3173_v59 = vadd.f32 %v3172_v2, %v3171_v34  ;;  %v3069_v20 = vpop.f32.mrb[99].mxu1  ;;  %v3174_v4 = vpop.f32.mrb[126].mxu0 }
 0x299   : > { %v1852_v36 = vadd.f32 %v3067_v43, %v4231_v61  ;;  %v3070_v47 = vadd.f32 %v3069_v20, %v3068_v30  ;;  %v3175_v6 = vpop.f32.mrb[127].mxu0 }
 0x29a   : > { %v3176_v9 = vadd.f32 %v3175_v6, %v3174_v4  ;;  %v4329_v3 = vadd.f32 %v3173_v59, %v1844_v31 }
 0x29b   : > { %v1855_v24 = vadd.f32 %v3070_v47, %v4235_v54 }
 0x29c   : > { %v4332_v56 = vadd.f32 %v3176_v9, %v1847_v53 }
 0x29d   : > { %v3071_v28 = vpop.f32.mrb[100].mxu1 }
 0x29e   : > { %v3072_v37 = vpop.f32.mrb[101].mxu1  ;;  %v3177_v7 = vpop.f32.mrb[128].mxu0 }
 0x29f   : > { %v3073_v14 = vadd.f32 %v3072_v37, %v3071_v28  ;;  %v3074_v62 = vpop.f32.mrb[102].mxu1  ;;  %v3178_v51 = vpop.f32.mrb[129].mxu0 }
 0x2a0   : > { %v3179_v10 = vadd.f32 %v3178_v51, %v3177_v7  ;;  %v3075_v42 = vpop.f32.mrb[103].mxu1  ;;  %v3180_v18 = vpop.f32.mrb[130].mxu0 }
 0x2a1   : > { %v1860_v61 = vadd.f32 %v3073_v14, %v4239_v46  ;;  %v3076_v8 = vadd.f32 %v3075_v42, %v3074_v62  ;;  %v3181_v41 = vpop.f32.mrb[131].mxu0 }
 0x2a2   : > { %v3182_v39 = vadd.f32 %v3181_v41, %v3180_v18  ;;  %v4335_v26 = vadd.f32 %v3179_v10, %v1852_v36 }
 0x2a3   : > { %v1863_v54 = vadd.f32 %v3076_v8, %v4243_v11 }
 0x2a4   : > { %v4338_v31 = vadd.f32 %v3182_v39, %v1855_v24 }
 0x2a5   : > { %v3077_v33 = vpop.f32.mrb[104].mxu1 }
 0x2a6   : > { %v3078_v16 = vpop.f32.mrb[105].mxu1  ;;  %v3183_v44 = vpop.f32.mrb[132].mxu0 }
 0x2a7   : > { %v3079_v53 = vadd.f32 %v3078_v16, %v3077_v33  ;;  %v3080_v21 = vpop.f32.mrb[106].mxu1  ;;  %v3184_v29 = vpop.f32.mrb[133].mxu0 }
 0x2a8   : > { %v3185_v34 = vadd.f32 %v3184_v29, %v3183_v44  ;;  %v3081_v43 = vpop.f32.mrb[107].mxu1  ;;  %v3186_v30 = vpop.f32.mrb[134].mxu0 }
 0x2a9   : > { %v1868_v46 = vadd.f32 %v3079_v53, %v4247_v17  ;;  %v3082_v2 = vadd.f32 %v3081_v43, %v3080_v21  ;;  %v3187_v59 = vpop.f32.mrb[135].mxu0 }
 0x2aa   : > { %v3188_v20 = vadd.f32 %v3187_v59, %v3186_v30  ;;  %v4341_v4 = vadd.f32 %v3185_v34, %v1860_v61 }
 0x2ab   : > { %v1871_v11 = vadd.f32 %v3082_v2, %v4251_v13 }
 0x2ac   : > { %v4344_v36 = vadd.f32 %v3188_v20, %v1863_v54 }
 0x2ad   : > { %v3083_v47 = vpop.f32.mrb[108].mxu1 }
 0x2ae   : > { %v3084_v6 = vpop.f32.mrb[109].mxu1  ;;  %v3189_v9 = vpop.f32.mrb[136].mxu0 }
 0x2af   : > { %v3085_v24 = vadd.f32 %v3084_v6, %v3083_v47  ;;  %v3086_v28 = vpop.f32.mrb[110].mxu1  ;;  %v3190_v37 = vpop.f32.mrb[137].mxu0 }
 0x2b0   : > { %v3191_v7 = vadd.f32 %v3190_v37, %v3189_v9  ;;  %v3087_v14 = vpop.f32.mrb[111].mxu1  ;;  %v3192_v62 = vpop.f32.mrb[138].mxu0 }
 0x2b1   : > { %v1876_v17 = vadd.f32 %v3085_v24, %v4255_v0  ;;  %v3088_v51 = vadd.f32 %v3087_v14, %v3086_v28  ;;  %v3193_v10 = vpop.f32.mrb[139].mxu0 }
 0x2b2   : > { %v3194_v42 = vadd.f32 %v3193_v10, %v3192_v62  ;;  %v4347_v18 = vadd.f32 %v3191_v7, %v1868_v46 }
 0x2b3   : > { %v1879_v13 = vadd.f32 %v3088_v51, %v4258_v45 }
 0x2b4   : > { %v4350_v61 = vadd.f32 %v3194_v42, %v1871_v11 }
 0x2b5   : > { %v3089_v8 = vpop.f32.mrb[112].mxu1 }
 0x2b6   : > { %v3090_v41 = vpop.f32.mrb[113].mxu1  ;;  %v3195_v39 = vpop.f32.mrb[140].mxu0 }
 0x2b7   : > { %v3091_v54 = vadd.f32 %v3090_v41, %v3089_v8  ;;  %v3092_v33 = vpop.f32.mrb[114].mxu1  ;;  %v3196_v16 = vpop.f32.mrb[141].mxu0 }
 0x2b8   : > { %v3197_v44 = vadd.f32 %v3196_v16, %v3195_v39  ;;  %v3093_v53 = vpop.f32.mrb[115].mxu1  ;;  %v3198_v21 = vpop.f32.mrb[142].mxu0 }
 0x2b9   : > { %v1884_v0 = vadd.f32 %v3091_v54, %v4262_v12  ;;  %v3094_v29 = vadd.f32 %v3093_v53, %v3092_v33  ;;  %v3199_v34 = vpop.f32.mrb[143].mxu0 }
 0x2ba   : > { %v3200_v43 = vadd.f32 %v3199_v34, %v3198_v21  ;;  %v4353_v30 = vadd.f32 %v3197_v44, %v1876_v17 }
 0x2bb   : > { %v1887_v45 = vadd.f32 %v3094_v29, %v4264_v5 }
 0x2bc   : > { %v4356_v46 = vadd.f32 %v3200_v43, %v1879_v13 }
 0x2bd   : > { %v3095_v2 = vpop.f32.mrb[116].mxu1 }
 0x2be   : > { %v3096_v59 = vpop.f32.mrb[117].mxu1  ;;  %v3201_v20 = vpop.f32.mrb[144].mxu0 }
 0x2bf   : > { %v3097_v11 = vadd.f32 %v3096_v59, %v3095_v2  ;;  %v3098_v47 = vpop.f32.mrb[118].mxu1  ;;  %v3202_v6 = vpop.f32.mrb[145].mxu0 }
 0x2c0   : > { %v3203_v9 = vadd.f32 %v3202_v6, %v3201_v20  ;;  %v3099_v24 = vpop.f32.mrb[119].mxu1  ;;  %v3204_v28 = vpop.f32.mrb[146].mxu0 }
 0x2c1   : > { %v1892_v12 = vadd.f32 %v3097_v11, %v4268_v23  ;;  %v3100_v37 = vadd.f32 %v3099_v24, %v3098_v47  ;;  %v3205_v7 = vpop.f32.mrb[147].mxu0 }
 0x2c2   : > { %v3206_v14 = vadd.f32 %v3205_v7, %v3204_v28  ;;  %v4359_v62 = vadd.f32 %v3203_v9, %v1884_v0 }
 0x2c3   : > { %v1895_v5 = vadd.f32 %v3100_v37, %v4270_v19 }
 0x2c4   : > { %v4362_v17 = vadd.f32 %v3206_v14, %v1887_v45 }
 0x2c5   : > { %v3101_v51 = vpop.f32.mrb[120].mxu1 }
 0x2c6   : > { %v3102_v10 = vpop.f32.mrb[121].mxu1  ;;  %v3207_v42 = vpop.f32.mrb[148].mxu0 }
 0x2c7   : > { %v3103_v13 = vadd.f32 %v3102_v10, %v3101_v51  ;;  %v3104_v8 = vpop.f32.mrb[122].mxu1  ;;  %v3208_v41 = vpop.f32.mrb[149].mxu0 }
 0x2c8   : > { %v3209_v39 = vadd.f32 %v3208_v41, %v3207_v42  ;;  %v3105_v54 = vpop.f32.mrb[123].mxu1  ;;  %v3210_v33 = vpop.f32.mrb[150].mxu0 }
 0x2c9   : > { %v1900_v23 = vadd.f32 %v3103_v13, %v4274_v50  ;;  %v3106_v16 = vadd.f32 %v3105_v54, %v3104_v8  ;;  %v3211_v44 = vpop.f32.mrb[151].mxu0 }
 0x2ca   : > { %v3212_v53 = vadd.f32 %v3211_v44, %v3210_v33  ;;  %v4365_v21 = vadd.f32 %v3209_v39, %v1892_v12 }
 0x2cb   : > { %v1903_v19 = vadd.f32 %v3106_v16, %v4276_v38 }
 0x2cc   : > { %v4368_v0 = vadd.f32 %v3212_v53, %v1895_v5 }
 0x2cd   : > { %v3107_v29 = vpop.f32.mrb[124].mxu1 }
 0x2ce   : > { %v3108_v34 = vpop.f32.mrb[125].mxu1  ;;  %v3213_v43 = vpop.f32.mrb[152].mxu0 }
 0x2cf   : > { %v3109_v45 = vadd.f32 %v3108_v34, %v3107_v29  ;;  %v3110_v2 = vpop.f32.mrb[126].mxu1  ;;  %v3214_v59 = vpop.f32.mrb[153].mxu0 }
 0x2d0   : > { %v3215_v20 = vadd.f32 %v3214_v59, %v3213_v43  ;;  %v3111_v11 = vpop.f32.mrb[127].mxu1  ;;  %v3216_v47 = vpop.f32.mrb[154].mxu0 }
 0x2d1   : > { %v1908_v50 = vadd.f32 %v3109_v45, %v4281_v15  ;;  %v3112_v6 = vadd.f32 %v3111_v11, %v3110_v2  ;;  %v3217_v9 = vpop.f32.mrb[155].mxu0 }
 0x2d2   : > { %v3218_v24 = vadd.f32 %v3217_v9, %v3216_v47  ;;  %v4371_v28 = vadd.f32 %v3215_v20, %v1900_v23 }
 0x2d3   : > { %v1911_v38 = vadd.f32 %v3112_v6, %v4284_v48 }
 0x2d4   : > { %v4374_v12 = vadd.f32 %v3218_v24, %v1903_v19 }
 0x2d5   : > { %v3315_v37 = vpop.f32.mrb[128].mxu1 }
 0x2d6   : > { %v2118_v7 = vadd.f32 %v3315_v37, %v4293_v57  ;;  %v3219_v14 = vpop.f32.mrb[156].mxu0  ;;  %v2109_v5 = vpop.f32.mrb[129].mxu1 }
 0x2d7   : > { %v2110_v51 = vadd.f32 %v2109_v5, %v4287_v32  ;;  %v3220_v10 = vpop.f32.mrb[157].mxu0  ;;  %v3316_v42 = vpop.f32.mrb[130].mxu1 }
 0x2d8   : > { %v3221_v15 = vadd.f32 %v3220_v10, %v3219_v14  ;;  %v2121_v13 = vadd.f32 %v3316_v42, %v4296_v49  ;;  %v3222_v8 = vpop.f32.mrb[158].mxu0  ;;  %v2112_v41 = vpop.f32.mrb[131].mxu1  ;;  %v2238_v54 = vmax.f32 %v2118_v7, 0.0 }
 0x2d9   : > { %v2113_v39 = vadd.f32 %v2112_v41, %v4290_v22  ;;  %v3223_v48 = vpop.f32.mrb[159].mxu0  ;;  %v2236_v57 = vmax.f32 %v2110_v51, 0.0 }
 0x2da   : > { %v2239_v33 = vmax.f32 %v2121_v13, 0.0  ;;  %v3224_v23 = vadd.f32 %v3223_v48, %v3222_v8  ;;  %v4380_v16 = vadd.f32 %v3221_v15, %v1908_v50 }
 0x2db   : > { %v2237_v32 = vmax.f32 %v2113_v39, 0.0 }
 0x2dc   : > { %v2666_v49 = vpack.c.bf16 %v2239_v33, %v2238_v54  ;;  %v4389_v44 = vadd.f32 %v3224_v23, %v1911_v38 }
 0x2dd   : > { %v2661_v22 = vpack.c.bf16 %v2237_v32, %v2236_v57  ;;  %v3319_v53 = vpop.f32.mrb[132].mxu1 }
 0x2de   : > { %2738 = vst [vmem:[%s4387_s13 + $0x8] sm:$0xff] %v2666_v49   ;;  %v2134_v19 = vadd.f32 %v3319_v53, %v4305_v25  ;;  %v2125_v29 = vpop.f32.mrb[133].mxu1 }
 0x2df   : > { %2662 = vst [vmem:[%s4387_s13] sm:$0xff] %v2661_v22   ;;  %v2126_v34 = vadd.f32 %v2125_v29, %v4299_v63  ;;  %v3320_v43 = vpop.f32.mrb[134].mxu1 }
 0x2e0   : > { %v2137_v45 = vadd.f32 %v3320_v43, %v4308_v1  ;;  %v2128_v2 = vpop.f32.mrb[135].mxu1  ;;  %v2242_v20 = vmax.f32 %v2134_v19, 0.0 }
 0x2e1   : > { %v2129_v59 = vadd.f32 %v2128_v2, %v4302_v55  ;;  %v2240_v47 = vmax.f32 %v2126_v34, 0.0 }
 0x2e2   : > { %v2243_v11 = vmax.f32 %v2137_v45, 0.0 }
 0x2e3   : > { %v2241_v50 = vmax.f32 %v2129_v59, 0.0 }
 0x2e4   : > { %v2676_v6 = vpack.c.bf16 %v2243_v11, %v2242_v20 }
 0x2e5   : > { %v2671_v9 = vpack.c.bf16 %v2241_v50, %v2240_v47  ;;  %v3323_v24 = vpop.f32.mrb[136].mxu1 }
 0x2e6   : > { %2740 = vst [vmem:[%s4387_s13 + $0x18] sm:$0xff] %v2676_v6   ;;  %v2150_v25 = vadd.f32 %v3323_v24, %v4317_v35  ;;  %v2141_v38 = vpop.f32.mrb[137].mxu1 }
 0x2e7   : > { %2739 = vst [vmem:[%s4387_s13 + $0x10] sm:$0xff] %v2671_v9   ;;  %v2142_v63 = vadd.f32 %v2141_v38, %v4311_v27  ;;  %v3324_v1 = vpop.f32.mrb[138].mxu1 }
 0x2e8   : > { %v2153_v37 = vadd.f32 %v3324_v1, %v4320_v58  ;;  %v2144_v55 = vpop.f32.mrb[139].mxu1  ;;  %v2246_v14 = vmax.f32 %v2150_v25, 0.0 }
 0x2e9   : > { %v2145_v7 = vadd.f32 %v2144_v55, %v4314_v40  ;;  %v2244_v51 = vmax.f32 %v2142_v63, 0.0 }
 0x2ea   : > { %v2247_v5 = vmax.f32 %v2153_v37, 0.0 }
 0x2eb   : > { %v2245_v10 = vmax.f32 %v2145_v7, 0.0 }
 0x2ec   : > { %v2686_v42 = vpack.c.bf16 %v2247_v5, %v2246_v14 }
 0x2ed   : > { %v2681_v15 = vpack.c.bf16 %v2245_v10, %v2244_v51  ;;  %v3327_v13 = vpop.f32.mrb[140].mxu1 }
 0x2ee   : > { %2742 = vst [vmem:[%s4387_s13 + $0x28] sm:$0xff] %v2686_v42   ;;  %v2166_v35 = vadd.f32 %v3327_v13, %v4329_v3  ;;  %v2157_v8 = vpop.f32.mrb[141].mxu1 }
 0x2ef   : > { %2741 = vst [vmem:[%s4387_s13 + $0x20] sm:$0xff] %v2681_v15   ;;  %v2158_v27 = vadd.f32 %v2157_v8, %v4323_v60  ;;  %v3328_v58 = vpop.f32.mrb[142].mxu1 }
 0x2f0   : > { %v2169_v41 = vadd.f32 %v3328_v58, %v4332_v56  ;;  %v2160_v40 = vpop.f32.mrb[143].mxu1  ;;  %v2250_v48 = vmax.f32 %v2166_v35, 0.0 }
 0x2f1   : > { %v2161_v39 = vadd.f32 %v2160_v40, %v4326_v52  ;;  %v2248_v33 = vmax.f32 %v2158_v27, 0.0 }
 0x2f2   : > { %v2251_v54 = vmax.f32 %v2169_v41, 0.0 }
 0x2f3   : > { %v2249_v23 = vmax.f32 %v2161_v39, 0.0 }
 0x2f4   : > { %v2696_v57 = vpack.c.bf16 %v2251_v54, %v2250_v48 }
 0x2f5   : > { %v2691_v32 = vpack.c.bf16 %v2249_v23, %v2248_v33  ;;  %v3331_v49 = vpop.f32.mrb[144].mxu1 }
 0x2f6   : > { %2744 = vst [vmem:[%s4387_s13 + $0x38] sm:$0xff] %v2696_v57   ;;  %v2182_v3 = vadd.f32 %v3331_v49, %v4341_v4  ;;  %v2173_v22 = vpop.f32.mrb[145].mxu1 }
 0x2f7   : > { %2743 = vst [vmem:[%s4387_s13 + $0x30] sm:$0xff] %v2691_v32   ;;  %v2174_v60 = vadd.f32 %v2173_v22, %v4335_v26  ;;  %v3332_v56 = vpop.f32.mrb[146].mxu1 }
 0x2f8   : > { %v2185_v53 = vadd.f32 %v3332_v56, %v4344_v36  ;;  %v2176_v52 = vpop.f32.mrb[147].mxu1  ;;  %v2254_v29 = vmax.f32 %v2182_v3, 0.0 }
 0x2f9   : > { %v2177_v19 = vadd.f32 %v2176_v52, %v4338_v31  ;;  %v2252_v43 = vmax.f32 %v2174_v60, 0.0 }
 0x2fa   : > { %v2255_v34 = vmax.f32 %v2185_v53, 0.0 }
 0x2fb   : > { %v2253_v45 = vmax.f32 %v2177_v19, 0.0 }
 0x2fc   : > { %v2706_v2 = vpack.c.bf16 %v2255_v34, %v2254_v29 }
 0x2fd   : > { %v2701_v59 = vpack.c.bf16 %v2253_v45, %v2252_v43  ;;  %v3335_v20 = vpop.f32.mrb[148].mxu1 }
 0x2fe   : > { %2746 = vst [vmem:[%s4387_s13 + $0x48] sm:$0xff] %v2706_v2   ;;  %v2198_v4 = vadd.f32 %v3335_v20, %v4353_v30  ;;  %v2189_v11 = vpop.f32.mrb[149].mxu1 }
 0x2ff   : > { %2745 = vst [vmem:[%s4387_s13 + $0x40] sm:$0xff] %v2701_v59   ;;  %v2190_v26 = vadd.f32 %v2189_v11, %v4347_v18  ;;  %v3336_v36 = vpop.f32.mrb[150].mxu1 }
 0x300   : > { %v2201_v47 = vadd.f32 %v3336_v36, %v4356_v46  ;;  %v2192_v31 = vpop.f32.mrb[151].mxu1  ;;  %v2258_v6 = vmax.f32 %v2198_v4, 0.0 }
 0x301   : > { %v2193_v50 = vadd.f32 %v2192_v31, %v4350_v61  ;;  %v2256_v24 = vmax.f32 %v2190_v26, 0.0 }
 0x302   : > { %v2259_v9 = vmax.f32 %v2201_v47, 0.0 }
 0x303   : > { %v2257_v25 = vmax.f32 %v2193_v50, 0.0 }
 0x304   : > { %v2716_v38 = vpack.c.bf16 %v2259_v9, %v2258_v6 }
 0x305   : > { %v2711_v63 = vpack.c.bf16 %v2257_v25, %v2256_v24  ;;  %v3339_v1 = vpop.f32.mrb[152].mxu1 }
 0x306   : > { %2748 = vst [vmem:[%s4387_s13 + $0x58] sm:$0xff] %v2716_v38   ;;  %v2214_v30 = vadd.f32 %v3339_v1, %v4365_v21  ;;  %v2205_v37 = vpop.f32.mrb[153].mxu1 }
 0x307   : > { %2747 = vst [vmem:[%s4387_s13 + $0x50] sm:$0xff] %v2711_v63   ;;  %v2206_v18 = vadd.f32 %v2205_v37, %v4359_v62  ;;  %v3340_v46 = vpop.f32.mrb[154].mxu1 }
 0x308   : > { %v2217_v55 = vadd.f32 %v3340_v46, %v4368_v0  ;;  %v2208_v61 = vpop.f32.mrb[155].mxu1  ;;  %v2262_v14 = vmax.f32 %v2214_v30, 0.0 }
 0x309   : > { %v2209_v7 = vadd.f32 %v2208_v61, %v4362_v17  ;;  %v2260_v51 = vmax.f32 %v2206_v18, 0.0 }
 0x30a   : > { %v2263_v5 = vmax.f32 %v2217_v55, 0.0 }
 0x30b   : > { %v2261_v10 = vmax.f32 %v2209_v7, 0.0 }
 0x30c   : > { %v2726_v42 = vpack.c.bf16 %v2263_v5, %v2262_v14 }
 0x30d   : > { %v2721_v15 = vpack.c.bf16 %v2261_v10, %v2260_v51  ;;  %v3343_v13 = vpop.f32.mrb[156].mxu1 }
 0x30e   : > { %2750 = vst [vmem:[%s4387_s13 + $0x68] sm:$0xff] %v2726_v42   ;;  %v2230_v21 = vadd.f32 %v3343_v13, %v4380_v16  ;;  %v2221_v35 = vpop.f32.mrb[157].mxu1 }
 0x30f   : > { %2749 = vst [vmem:[%s4387_s13 + $0x60] sm:$0xff] %v2721_v15   ;;  %v2222_v62 = vadd.f32 %v2221_v35, %v4371_v28  ;;  %v3344_v0 = vpop.f32.mrb[158].mxu1 }
 0x310   : > { %v2233_v8 = vadd.f32 %v3344_v0, %v4389_v44  ;;  %v2224_v17 = vpop.f32.mrb[159].mxu1  ;;  %v2266_v58 = vmax.f32 %v2230_v21, 0.0 }
 0x311   : > { %v2225_v27 = vadd.f32 %v2224_v17, %v4374_v12  ;;  %v2264_v40 = vmax.f32 %v2222_v62, 0.0 }
 0x312   : > { %v2267_v41 = vmax.f32 %v2233_v8, 0.0 }
 0x313   : > { %v2265_v39 = vmax.f32 %v2225_v27, 0.0 }
 0x314   : > { %v2736_v48 = vpack.c.bf16 %v2267_v41, %v2266_v58 }
 0x315   : > { %v2731_v54 = vpack.c.bf16 %v2265_v39, %v2264_v40 }
 0x316   : > { %2752 = vst [vmem:[%s4387_s13 + $0x78] sm:$0xff] %v2736_v48  }
 0x317   : > { %2751 = vst [vmem:[%s4387_s13 + $0x70] sm:$0xff] %v2731_v54  }
 0x318 PF: > { %s15_s18 = sadd.s32 1, %s3456_s18  }
 0x319   : > { %p12_p4 = scmp.ge.s32.totalorder %s15_s18, 4  }
 0x31b   :  { %14 = sbr.rel (!%p12_p4) target bundleno = 1 (0x1), region = 70 }

</bundles_post_ra>
